<compile_context>
chip_gen: v6e
topology: v6e:2x2x1
jax: 0.10.0
libtpu: 0.0.40
codegen_flags: <defaults>
</compile_context>

<pallas_src>
import functools

import jax
import jax.numpy as jnp
from jax.experimental import pallas as pl
from jax.experimental.pallas import tpu as pltpu


def _fused_decoder_kernel(
    toks_ref,                                             # SMEM (T,) int32  [scalar prefetch]
    emb_tbl_ref, enc_ref, h0_ref,                         # (V,H), (L,H), (1,H)
    w_attn_e_ref, w_attn_h_ref, b_attn_ref,               # (H,L), (H,L), (1,L)
    w_comb_e_ref, w_comb_a_ref, b_comb_ref,               # (H,H), (H,H), (1,H)
    w_ir_ref, w_iz_ref, w_in_ref, b_ir_ref, b_iz_ref, b_in_ref,   # (H,H)x3, (1,H)x3
    w_hr_ref, w_hz_ref, w_hn_ref, b_hr_ref, b_hz_ref, b_hn_ref,   # (H,H)x3, (1,H)x3
    w_out_ref, b_out_ref,                                 # (H,V), (1,V)
    logp_ref, hall_ref, attnw_ref,                        # outputs (T,V), (T,H), (T,L)
    h_scr,                                                # VMEM scratch (1,H) f32
):
    t = pl.program_id(0)

    # Initialize the recurrent carry from the provided initial hidden state.
    @pl.when(t == 0)
    def _():
        h_scr[...] = h0_ref[...]

    # In-kernel embedding lookup: token id from SMEM, row slice of VMEM table.
    tok = toks_ref[t]
    emb = emb_tbl_ref[pl.ds(tok, 1), :]                   # (1, H)
    hid = h_scr[...]                                      # (1, H)

    # --- attention weights: softmax over cat(emb, hid) @ W_attn, concat-free ---
    attn_logits = (
        jnp.dot(emb, w_attn_e_ref[...], preferred_element_type=jnp.float32)
        + jnp.dot(hid, w_attn_h_ref[...], preferred_element_type=jnp.float32)
        + b_attn_ref[...]
    )                                                     # (1, L)
    m = jnp.max(attn_logits, axis=1, keepdims=True)
    exp_l = jnp.exp(attn_logits - m)
    attn_w = exp_l * pl.reciprocal(jnp.sum(exp_l, axis=1, keepdims=True), approx=True)

    # --- attn_applied = attn_w @ encoder_outputs ---
    attn_applied = jnp.dot(attn_w, enc_ref[...], preferred_element_type=jnp.float32)  # (1, H)

    # --- attn_combine + relu (concat-free) ---
    x = (
        jnp.dot(emb, w_comb_e_ref[...], preferred_element_type=jnp.float32)
        + jnp.dot(attn_applied, w_comb_a_ref[...], preferred_element_type=jnp.float32)
        + b_comb_ref[...]
    )
    x = jnp.maximum(x, 0.0)                               # (1, H)

    # --- GRU cell, PyTorch gate order (r, z, n), per-gate weight matrices ---
    r = jax.nn.sigmoid(
        jnp.dot(x, w_ir_ref[...], preferred_element_type=jnp.float32) + b_ir_ref[...]
        + jnp.dot(hid, w_hr_ref[...], preferred_element_type=jnp.float32) + b_hr_ref[...]
    )
    z = jax.nn.sigmoid(
        jnp.dot(x, w_iz_ref[...], preferred_element_type=jnp.float32) + b_iz_ref[...]
        + jnp.dot(hid, w_hz_ref[...], preferred_element_type=jnp.float32) + b_hz_ref[...]
    )
    n = jnp.tanh(
        jnp.dot(x, w_in_ref[...], preferred_element_type=jnp.float32) + b_in_ref[...]
        + r * (jnp.dot(hid, w_hn_ref[...], preferred_element_type=jnp.float32) + b_hn_ref[...])
    )
    h_new = (1.0 - z) * n + z * hid                       # (1, H)
    h_scr[...] = h_new                                    # carry to next step

    # --- output projection + (exact) log_softmax ---
    logits = jnp.dot(h_new, w_out_ref[...], preferred_element_type=jnp.float32) + b_out_ref[...]
    mo = jnp.max(logits, axis=1, keepdims=True)
    shifted = logits - mo
    lse = jnp.log(jnp.sum(jnp.exp(shifted), axis=1, keepdims=True))
    logp = shifted - lse                                  # (1, V)

    # --- write step results into the resident output blocks (one HBM writeback at the end) ---
    logp_ref[pl.ds(t, 1), :] = logp
    hall_ref[pl.ds(t, 1), :] = h_new
    attnw_ref[pl.ds(t, 1), :] = attn_w


def _split_params(params):
    """Trace-time pre-splitting of weights: removes in-kernel concat & gate slicing."""
    H = params["w_comb"].shape[1]
    w_attn, w_comb = params["w_attn"], params["w_comb"]
    w_ih, w_hh = params["w_ih"], params["w_hh"]
    b_ih, b_hh = params["b_ih"], params["b_hh"]
    return dict(
        w_attn_e=w_attn[:H], w_attn_h=w_attn[H:], b_attn=params["b_attn"],
        w_comb_e=w_comb[:H], w_comb_a=w_comb[H:], b_comb=params["b_comb"],
        w_ir=w_ih[:, :H], w_iz=w_ih[:, H:2 * H], w_in=w_ih[:, 2 * H:],
        b_ir=b_ih[:, :H], b_iz=b_ih[:, H:2 * H], b_in=b_ih[:, 2 * H:],
        w_hr=w_hh[:, :H], w_hz=w_hh[:, H:2 * H], w_hn=w_hh[:, 2 * H:],
        b_hr=b_hh[:, :H], b_hz=b_hh[:, H:2 * H], b_hn=b_hh[:, 2 * H:],
        w_out=params["w_out"], b_out=params["b_out"],
    )


def attn_decoder_decode(params, tokens, hidden0, encoder_outputs):
    """Fused multi-step decode (teacher-forced token sequence) in ONE pallas_call.

    tokens: (T,) int32, hidden0: (1,1,H), encoder_outputs: (L,H).
    Returns: log_probs (T,V), hiddens (T,H), attn_weights (T,L).
    """
    H = params["w_comb"].shape[1]
    L = params["w_attn"].shape[1]
    V = params["w_out"].shape[1]
    T = tokens.shape[0]
    sp = _split_params(params)

    emb_tbl = params["embedding"].astype(jnp.float32)
    enc = encoder_outputs.astype(jnp.float32)
    h0 = hidden0.reshape(1, H).astype(jnp.float32)

    ordered = (
        emb_tbl, enc, h0,
        sp["w_attn_e"], sp["w_attn_h"], sp["b_attn"],
        sp["w_comb_e"], sp["w_comb_a"], sp["b_comb"],
        sp["w_ir"], sp["w_iz"], sp["w_in"], sp["b_ir"], sp["b_iz"], sp["b_in"],
        sp["w_hr"], sp["w_hz"], sp["w_hn"], sp["b_hr"], sp["b_hz"], sp["b_hn"],
        sp["w_out"], sp["b_out"],
    )

    def full_resident(shape):
        # Full-array block, constant block index -> DMA'd once, VMEM-resident
        # across the whole decode grid.
        return pl.BlockSpec(shape, lambda t, toks: (0,) * len(shape))

    grid_spec = pltpu.PrefetchScalarGridSpec(
        num_scalar_prefetch=1,                 # tokens -> SMEM, visible to kernel & index_maps
        grid=(T,),
        in_specs=[full_resident(a.shape) for a in ordered],
        out_specs=[
            pl.BlockSpec((T, V), lambda t, toks: (0, 0)),
            pl.BlockSpec((T, H), lambda t, toks: (0, 0)),
            pl.BlockSpec((T, L), lambda t, toks: (0, 0)),
        ],
        scratch_shapes=[pltpu.VMEM((1, H), jnp.float32)],   # recurrent hidden carry
    )

    logp, h_all, attn_w = pl.pallas_call(
        _fused_decoder_kernel,
        grid_spec=grid_spec,
        out_shape=(
            jax.ShapeDtypeStruct((T, V), jnp.float32),
            jax.ShapeDtypeStruct((T, H), jnp.float32),
            jax.ShapeDtypeStruct((T, L), jnp.float32),
        ),
        compiler_params=pltpu.CompilerParams(
            dimension_semantics=("arbitrary",),            # sequential recurrence
        ),
    )(tokens.astype(jnp.int32), *ordered)
    return logp, h_all, attn_w


def attn_decoder_step(params, token, hidden, encoder_outputs):
    """One decode step with the PyTorch module's return shapes: (1,V), (1,1,H), (1,L)."""
    H = params["w_comb"].shape[1]
    tokens = jnp.reshape(token, (1,)).astype(jnp.int32)
    logp, h_all, attn_w = attn_decoder_decode(params, tokens, hidden, encoder_outputs)
    return logp, h_all.reshape(1, 1, H), attn_w


def init_params(key, embedding_size, hidden_size, output_size, max_length):
    assert embedding_size == hidden_size, "attn layer requires embedding_size == hidden_size"
    ks = jax.random.split(key, 13)
    u = lambda k, shape, s: jax.random.uniform(k, shape, jnp.float32, -s, s)
    H, L, V = hidden_size, max_length, output_size
    s_lin2h = 1.0 / jnp.sqrt(2.0 * H)
    s_h = 1.0 / jnp.sqrt(1.0 * H)
    return {
        "embedding": jax.random.normal(ks[0], (V, embedding_size), jnp.float32),
        # Linear weights stored as (in, out)  (transpose of PyTorch layout)
        "w_attn": u(ks[1], (2 * H, L), s_lin2h),
        "b_attn": u(ks[2], (1, L), s_lin2h),
        "w_comb": u(ks[3], (2 * H, H), s_lin2h),
        "b_comb": u(ks[4], (1, H), s_lin2h),
        # GRU weights, gate order (r, z, n), stored as (in, 3H)
        "w_ih": u(ks[5], (H, 3 * H), s_h),
        "b_ih": u(ks[6], (1, 3 * H), s_h),
        "w_hh": u(ks[7], (H, 3 * H), s_h),
        "b_hh": u(ks[8], (1, 3 * H), s_h),
        "w_out": u(ks[9], (H, V), s_h),
        "b_out": u(ks[10], (1, V), s_h),
    }


def _reference_step(params, token, hidden, encoder_outputs):
    """Pure-JAX reference of one forward step (matches the PyTorch module)."""
    H = params["w_comb"].shape[1]
    emb = params["embedding"][token].reshape(1, H)
    hid = hidden.reshape(1, H)
    cat1 = jnp.concatenate([emb, hid], axis=1)
    attn_w = jax.nn.softmax(cat1 @ params["w_attn"] + params["b_attn"], axis=1)
    attn_applied = attn_w @ encoder_outputs
    x = jax.nn.relu(jnp.concatenate([emb, attn_applied], axis=1)
                    @ params["w_comb"] + params["b_comb"])
    gi = x @ params["w_ih"] + params["b_ih"]
    gh = hid @ params["w_hh"] + params["b_hh"]
    r = jax.nn.sigmoid(gi[:, :H] + gh[:, :H])
    z = jax.nn.sigmoid(gi[:, H:2 * H] + gh[:, H:2 * H])
    n = jnp.tanh(gi[:, 2 * H:] + r * gh[:, 2 * H:])
    h_new = (1.0 - z) * n + z * hid
    logp = jax.nn.log_softmax(h_new @ params["w_out"] + params["b_out"], axis=1)
    return logp, h_new.reshape(1, 1, H), attn_w


def _reference_decode(params, tokens, hidden0, encoder_outputs):
    logps, hs, aws = [], [], []
    hidden = hidden0
    for t in range(tokens.shape[0]):
        logp, hidden, aw = _reference_step(params, tokens[t], hidden, encoder_outputs)
        logps.append(logp)
        hs.append(hidden.reshape(1, -1))
        aws.append(aw)
    return (jnp.concatenate(logps, 0), jnp.concatenate(hs, 0), jnp.concatenate(aws, 0))


if __name__ == "__main__":
    EMBED = 32
    HIDDEN = 32
    OUTPUT = 64            # vocab size
    MAX_LENGTH = 15
    MAXL = MAX_LENGTH + 1  # the module uses MAX_LENGTH + 1
    T = 8                  # decode steps fused into one kernel launch

    key = jax.random.PRNGKey(0)
    kp, kt, kh, ke = jax.random.split(key, 4)

    params = init_params(kp, EMBED, HIDDEN, OUTPUT, MAXL)
    tokens = jax.random.randint(kt, (T,), 0, OUTPUT, dtype=jnp.int32)
    hidden0 = jax.random.normal(kh, (1, 1, HIDDEN), jnp.float32) * 0.1
    encoder_outputs = jax.random.normal(ke, (MAXL, HIDDEN), jnp.float32) * 0.1

    # Fused multi-step decode (single pallas_call for all T steps).
    decode = jax.jit(functools.partial(attn_decoder_decode, params))
    logp, h_all, attn_w = decode(tokens, hidden0, encoder_outputs)
    jax.block_until_ready((logp, h_all, attn_w))

    # Correctness vs. pure-JAX reference loop.  Tolerances are loosened slightly
    # because the attention-softmax denominator uses the approximate (EUP) reciprocal.
    r_logp, r_h, r_aw = _reference_decode(params, tokens, hidden0, encoder_outputs)
    assert logp.shape == (T, OUTPUT) and h_all.shape == (T, HIDDEN) and attn_w.shape == (T, MAXL)
    assert jnp.allclose(attn_w, r_aw, atol=5e-3)
    assert jnp.allclose(h_all, r_h, atol=5e-3)
    assert jnp.allclose(logp, r_logp, atol=5e-3)

    # Single-step path matching the PyTorch forward's signature/returns.
    step = jax.jit(functools.partial(attn_decoder_step, params))
    s_logp, s_h, s_aw = step(tokens[0], hidden0, encoder_outputs)
    jax.block_until_ready((s_logp, s_h, s_aw))
    rs_logp, rs_h, rs_aw = _reference_step(params, tokens[0], hidden0, encoder_outputs)
    assert s_logp.shape == (1, OUTPUT) and s_h.shape == (1, 1, HIDDEN) and s_aw.shape == (1, MAXL)
    assert jnp.allclose(s_logp, rs_logp, atol=5e-3)
    assert jnp.allclose(s_h, rs_h, atol=5e-3)
    assert jnp.allclose(s_aw, rs_aw, atol=5e-3)

    print("KERNEL_OK")
</pallas_src>

<mosaic_0001>
module attributes {stable_mosaic.version = 11 : i64} {
  func.func @_fused_decoder_kernel(%arg0: i32, %arg1: memref<8xi32, #tpu.memory_space<smem>>, %arg2: memref<64x32xf32, #tpu.memory_space<vmem>>, %arg3: memref<16x32xf32, #tpu.memory_space<vmem>>, %arg4: memref<1x32xf32, #tpu.memory_space<vmem>>, %arg5: memref<32x16xf32, #tpu.memory_space<vmem>>, %arg6: memref<32x16xf32, #tpu.memory_space<vmem>>, %arg7: memref<1x16xf32, #tpu.memory_space<vmem>>, %arg8: memref<32x32xf32, #tpu.memory_space<vmem>>, %arg9: memref<32x32xf32, #tpu.memory_space<vmem>>, %arg10: memref<1x32xf32, #tpu.memory_space<vmem>>, %arg11: memref<32x32xf32, #tpu.memory_space<vmem>>, %arg12: memref<32x32xf32, #tpu.memory_space<vmem>>, %arg13: memref<32x32xf32, #tpu.memory_space<vmem>>, %arg14: memref<1x32xf32, #tpu.memory_space<vmem>>, %arg15: memref<1x32xf32, #tpu.memory_space<vmem>>, %arg16: memref<1x32xf32, #tpu.memory_space<vmem>>, %arg17: memref<32x32xf32, #tpu.memory_space<vmem>>, %arg18: memref<32x32xf32, #tpu.memory_space<vmem>>, %arg19: memref<32x32xf32, #tpu.memory_space<vmem>>, %arg20: memref<1x32xf32, #tpu.memory_space<vmem>>, %arg21: memref<1x32xf32, #tpu.memory_space<vmem>>, %arg22: memref<1x32xf32, #tpu.memory_space<vmem>>, %arg23: memref<32x64xf32, #tpu.memory_space<vmem>>, %arg24: memref<1x64xf32, #tpu.memory_space<vmem>>, %arg25: memref<8x64xf32, #tpu.memory_space<vmem>>, %arg26: memref<8x32xf32, #tpu.memory_space<vmem>>, %arg27: memref<8x16xf32, #tpu.memory_space<vmem>>, %arg28: memref<1x32xf32, #tpu.memory_space<vmem>>) attributes {dimension_semantics = [#tpu.dimension_semantics<arbitrary>], iteration_bounds = array<i64: 8>, scalar_prefetch = 1 : i64, scratch_operands = 1 : i64, tpu.core_type = #tpu.core_type<tc>, window_params = [{pipeline_mode = #tpu.pipeline_mode<synchronous>, transform_indices = @transform_0, window_bounds = array<i64: 64, 32>}, {pipeline_mode = #tpu.pipeline_mode<synchronous>, transform_indices = @transform_1, window_bounds = array<i64: 16, 32>}, {pipeline_mode = #tpu.pipeline_mode<synchronous>, transform_indices = @transform_2, window_bounds = array<i64: 1, 32>}, {pipeline_mode = #tpu.pipeline_mode<synchronous>, transform_indices = @transform_3, window_bounds = array<i64: 32, 16>}, {pipeline_mode = #tpu.pipeline_mode<synchronous>, transform_indices = @transform_4, window_bounds = array<i64: 32, 16>}, {pipeline_mode = #tpu.pipeline_mode<synchronous>, transform_indices = @transform_5, window_bounds = array<i64: 1, 16>}, {pipeline_mode = #tpu.pipeline_mode<synchronous>, transform_indices = @transform_6, window_bounds = array<i64: 32, 32>}, {pipeline_mode = #tpu.pipeline_mode<synchronous>, transform_indices = @transform_7, window_bounds = array<i64: 32, 32>}, {pipeline_mode = #tpu.pipeline_mode<synchronous>, transform_indices = @transform_8, window_bounds = array<i64: 1, 32>}, {pipeline_mode = #tpu.pipeline_mode<synchronous>, transform_indices = @transform_9, window_bounds = array<i64: 32, 32>}, {pipeline_mode = #tpu.pipeline_mode<synchronous>, transform_indices = @transform_10, window_bounds = array<i64: 32, 32>}, {pipeline_mode = #tpu.pipeline_mode<synchronous>, transform_indices = @transform_11, window_bounds = array<i64: 32, 32>}, {pipeline_mode = #tpu.pipeline_mode<synchronous>, transform_indices = @transform_12, window_bounds = array<i64: 1, 32>}, {pipeline_mode = #tpu.pipeline_mode<synchronous>, transform_indices = @transform_13, window_bounds = array<i64: 1, 32>}, {pipeline_mode = #tpu.pipeline_mode<synchronous>, transform_indices = @transform_14, window_bounds = array<i64: 1, 32>}, {pipeline_mode = #tpu.pipeline_mode<synchronous>, transform_indices = @transform_15, window_bounds = array<i64: 32, 32>}, {pipeline_mode = #tpu.pipeline_mode<synchronous>, transform_indices = @transform_16, window_bounds = array<i64: 32, 32>}, {pipeline_mode = #tpu.pipeline_mode<synchronous>, transform_indices = @transform_17, window_bounds = array<i64: 32, 32>}, {pipeline_mode = #tpu.pipeline_mode<synchronous>, transform_indices = @transform_18, window_bounds = array<i64: 1, 32>}, {pipeline_mode = #tpu.pipeline_mode<synchronous>, transform_indices = @transform_19, window_bounds = array<i64: 1, 32>}, {pipeline_mode = #tpu.pipeline_mode<synchronous>, transform_indices = @transform_20, window_bounds = array<i64: 1, 32>}, {pipeline_mode = #tpu.pipeline_mode<synchronous>, transform_indices = @transform_21, window_bounds = array<i64: 32, 64>}, {pipeline_mode = #tpu.pipeline_mode<synchronous>, transform_indices = @transform_22, window_bounds = array<i64: 1, 64>}, {pipeline_mode = #tpu.pipeline_mode<synchronous>, transform_indices = @transform_23, window_bounds = array<i64: 8, 64>}, {pipeline_mode = #tpu.pipeline_mode<synchronous>, transform_indices = @transform_24, window_bounds = array<i64: 8, 32>}, {pipeline_mode = #tpu.pipeline_mode<synchronous>, transform_indices = @transform_25, window_bounds = array<i64: 8, 16>}]} {
    %c0_i32 = arith.constant 0 : i32
    %0 = arith.cmpi eq, %arg0, %c0_i32 : i32
    %1 = arith.extui %0 : i1 to i32
    %c0_i32_0 = arith.constant 0 : i32
    %2 = arith.cmpi ne, %1, %c0_i32_0 : i32
    scf.if %2 {
      %c0_69 = arith.constant 0 : index
      %c0_70 = arith.constant 0 : index
      %101 = vector.load %arg4[%c0_69, %c0_70] : memref<1x32xf32, #tpu.memory_space<vmem>>, vector<1x32xf32>
      %c0_71 = arith.constant 0 : index
      %c0_72 = arith.constant 0 : index
      %102 = vector.load %arg28[%c0_71, %c0_72] : memref<1x32xf32, #tpu.memory_space<vmem>>, vector<1x32xf32>
      tpu.vector_store %arg28[%c0_71, %c0_72], %101 {strides = array<i32>} : memref<1x32xf32, #tpu.memory_space<vmem>>, vector<1x32xf32>,
    } else {
    }
    %3 = arith.index_cast %arg0 : i32 to index
    %4 = memref.load %arg1[%3] : memref<8xi32, #tpu.memory_space<smem>>
    %5 = arith.index_cast %4 : i32 to index
    %c0 = arith.constant 0 : index
    %6 = vector.load %arg2[%5, %c0] : memref<64x32xf32, #tpu.memory_space<vmem>>, vector<1x32xf32>
    %c0_1 = arith.constant 0 : index
    %c0_2 = arith.constant 0 : index
    %7 = vector.load %arg28[%c0_1, %c0_2] : memref<1x32xf32, #tpu.memory_space<vmem>>, vector<1x32xf32>
    %c0_3 = arith.constant 0 : index
    %c0_4 = arith.constant 0 : index
    %8 = vector.load %arg5[%c0_3, %c0_4] : memref<32x16xf32, #tpu.memory_space<vmem>>, vector<32x16xf32>
    %cst = arith.constant dense<0.000000e+00> : vector<1x16xf32>
    %9 = tpu.matmul %6, %8, %cst {dimension_numbers = #tpu.dot_dimension_numbers<[1], [0], [0], [1], [0, 0, 1, 1], [], []>} : vector<1x32xf32>, vector<32x16xf32>, vector<1x16xf32> -> vector<1x16xf32>
    %c0_5 = arith.constant 0 : index
    %c0_6 = arith.constant 0 : index
    %10 = vector.load %arg6[%c0_5, %c0_6] : memref<32x16xf32, #tpu.memory_space<vmem>>, vector<32x16xf32>
    %cst_7 = arith.constant dense<0.000000e+00> : vector<1x16xf32>
    %11 = tpu.matmul %7, %10, %cst_7 {dimension_numbers = #tpu.dot_dimension_numbers<[1], [0], [0], [1], [0, 0, 1, 1], [], []>} : vector<1x32xf32>, vector<32x16xf32>, vector<1x16xf32> -> vector<1x16xf32>
    %12 = arith.addf %9, %11 : vector<1x16xf32>
    %c0_8 = arith.constant 0 : index
    %c0_9 = arith.constant 0 : index
    %13 = vector.load %arg7[%c0_8, %c0_9] : memref<1x16xf32, #tpu.memory_space<vmem>>, vector<1x16xf32>
    %14 = arith.addf %12, %13 : vector<1x16xf32>
    %cst_10 = arith.constant dense<0xFF800000> : vector<1xf32>
    %15 = vector.multi_reduction <maximumf>, %14, %cst_10 [1] : vector<1x16xf32> to vector<1xf32>
    %16 = vector.shape_cast %15 : vector<1xf32> to vector<1x1xf32>
    %17 = vector.broadcast %16 : vector<1x1xf32> to vector<1x16xf32>
    %18 = arith.subf %14, %17 : vector<1x16xf32>
    %19 = math.exp %18 : vector<1x16xf32>
    %cst_11 = arith.constant dense<0.000000e+00> : vector<1xf32>
    %20 = vector.multi_reduction <add>, %19, %cst_11 [1] : vector<1x16xf32> to vector<1xf32>
    %21 = vector.shape_cast %20 : vector<1xf32> to vector<1x1xf32>
    %22 = tpu.reciprocal %21 {approx = true} : vector<1x1xf32> -> vector<1x1xf32>
    %23 = vector.broadcast %22 : vector<1x1xf32> to vector<1x16xf32>
    %24 = arith.mulf %19, %23 : vector<1x16xf32>
    %c0_12 = arith.constant 0 : index
    %c0_13 = arith.constant 0 : index
    %25 = vector.load %arg3[%c0_12, %c0_13] : memref<16x32xf32, #tpu.memory_space<vmem>>, vector<16x32xf32>
    %cst_14 = arith.constant dense<0.000000e+00> : vector<1x32xf32>
    %26 = tpu.matmul %24, %25, %cst_14 {dimension_numbers = #tpu.dot_dimension_numbers<[1], [0], [0], [1], [0, 0, 1, 1], [], []>} : vector<1x16xf32>, vector<16x32xf32>, vector<1x32xf32> -> vector<1x32xf32>
    %c0_15 = arith.constant 0 : index
    %c0_16 = arith.constant 0 : index
    %27 = vector.load %arg8[%c0_15, %c0_16] : memref<32x32xf32, #tpu.memory_space<vmem>>, vector<32x32xf32>
    %cst_17 = arith.constant dense<0.000000e+00> : vector<1x32xf32>
    %28 = tpu.matmul %6, %27, %cst_17 {dimension_numbers = #tpu.dot_dimension_numbers<[1], [0], [0], [1], [0, 0, 1, 1], [], []>} : vector<1x32xf32>, vector<32x32xf32>, vector<1x32xf32> -> vector<1x32xf32>
    %c0_18 = arith.constant 0 : index
    %c0_19 = arith.constant 0 : index
    %29 = vector.load %arg9[%c0_18, %c0_19] : memref<32x32xf32, #tpu.memory_space<vmem>>, vector<32x32xf32>
    %cst_20 = arith.constant dense<0.000000e+00> : vector<1x32xf32>
    %30 = tpu.matmul %26, %29, %cst_20 {dimension_numbers = #tpu.dot_dimension_numbers<[1], [0], [0], [1], [0, 0, 1, 1], [], []>} : vector<1x32xf32>, vector<32x32xf32>, vector<1x32xf32> -> vector<1x32xf32>
    %31 = arith.addf %28, %30 : vector<1x32xf32>
    %c0_21 = arith.constant 0 : index
    %c0_22 = arith.constant 0 : index
    %32 = vector.load %arg10[%c0_21, %c0_22] : memref<1x32xf32, #tpu.memory_space<vmem>>, vector<1x32xf32>
    %33 = arith.addf %31, %32 : vector<1x32xf32>
    %cst_23 = arith.constant 0.000000e+00 : f32
    %34 = vector.broadcast %cst_23 : f32 to vector<1x32xf32>
    %35 = arith.maximumf %33, %34 : vector<1x32xf32>
    %c0_24 = arith.constant 0 : index
    %c0_25 = arith.constant 0 : index
    %36 = vector.load %arg11[%c0_24, %c0_25] : memref<32x32xf32, #tpu.memory_space<vmem>>, vector<32x32xf32>
    %cst_26 = arith.constant dense<0.000000e+00> : vector<1x32xf32>
    %37 = tpu.matmul %35, %36, %cst_26 {dimension_numbers = #tpu.dot_dimension_numbers<[1], [0], [0], [1], [0, 0, 1, 1], [], []>} : vector<1x32xf32>, vector<32x32xf32>, vector<1x32xf32> -> vector<1x32xf32>
    %c0_27 = arith.constant 0 : index
    %c0_28 = arith.constant 0 : index
    %38 = vector.load %arg14[%c0_27, %c0_28] : memref<1x32xf32, #tpu.memory_space<vmem>>, vector<1x32xf32>
    %39 = arith.addf %37, %38 : vector<1x32xf32>
    %c0_29 = arith.constant 0 : index
    %c0_30 = arith.constant 0 : index
    %40 = vector.load %arg17[%c0_29, %c0_30] : memref<32x32xf32, #tpu.memory_space<vmem>>, vector<32x32xf32>
    %cst_31 = arith.constant dense<0.000000e+00> : vector<1x32xf32>
    %41 = tpu.matmul %7, %40, %cst_31 {dimension_numbers = #tpu.dot_dimension_numbers<[1], [0], [0], [1], [0, 0, 1, 1], [], []>} : vector<1x32xf32>, vector<32x32xf32>, vector<1x32xf32> -> vector<1x32xf32>
    %42 = arith.addf %39, %41 : vector<1x32xf32>
    %c0_32 = arith.constant 0 : index
    %c0_33 = arith.constant 0 : index
    %43 = vector.load %arg20[%c0_32, %c0_33] : memref<1x32xf32, #tpu.memory_space<vmem>>, vector<1x32xf32>
    %44 = arith.addf %42, %43 : vector<1x32xf32>
    %45 = arith.negf %44 : vector<1x32xf32>
    %46 = math.exp %45 : vector<1x32xf32>
    %cst_34 = arith.constant 1.000000e+00 : f32
    %47 = vector.broadcast %cst_34 : f32 to vector<1x32xf32>
    %48 = arith.addf %47, %46 : vector<1x32xf32>
    %49 = arith.divf %47, %48 : vector<1x32xf32>
    %c0_35 = arith.constant 0 : index
    %c0_36 = arith.constant 0 : index
    %50 = vector.load %arg12[%c0_35, %c0_36] : memref<32x32xf32, #tpu.memory_space<vmem>>, vector<32x32xf32>
    %cst_37 = arith.constant dense<0.000000e+00> : vector<1x32xf32>
    %51 = tpu.matmul %35, %50, %cst_37 {dimension_numbers = #tpu.dot_dimension_numbers<[1], [0], [0], [1], [0, 0, 1, 1], [], []>} : vector<1x32xf32>, vector<32x32xf32>, vector<1x32xf32> -> vector<1x32xf32>
    %c0_38 = arith.constant 0 : index
    %c0_39 = arith.constant 0 : index
    %52 = vector.load %arg15[%c0_38, %c0_39] : memref<1x32xf32, #tpu.memory_space<vmem>>, vector<1x32xf32>
    %53 = arith.addf %51, %52 : vector<1x32xf32>
    %c0_40 = arith.constant 0 : index
    %c0_41 = arith.constant 0 : index
    %54 = vector.load %arg18[%c0_40, %c0_41] : memref<32x32xf32, #tpu.memory_space<vmem>>, vector<32x32xf32>
    %cst_42 = arith.constant dense<0.000000e+00> : vector<1x32xf32>
    %55 = tpu.matmul %7, %54, %cst_42 {dimension_numbers = #tpu.dot_dimension_numbers<[1], [0], [0], [1], [0, 0, 1, 1], [], []>} : vector<1x32xf32>, vector<32x32xf32>, vector<1x32xf32> -> vector<1x32xf32>
    %56 = arith.addf %53, %55 : vector<1x32xf32>
    %c0_43 = arith.constant 0 : index
    %c0_44 = arith.constant 0 : index
    %57 = vector.load %arg21[%c0_43, %c0_44] : memref<1x32xf32, #tpu.memory_space<vmem>>, vector<1x32xf32>
    %58 = arith.addf %56, %57 : vector<1x32xf32>
    %59 = arith.negf %58 : vector<1x32xf32>
    %60 = math.exp %59 : vector<1x32xf32>
    %cst_45 = arith.constant 1.000000e+00 : f32
    %61 = vector.broadcast %cst_45 : f32 to vector<1x32xf32>
    %62 = arith.addf %61, %60 : vector<1x32xf32>
    %63 = arith.divf %61, %62 : vector<1x32xf32>
    %c0_46 = arith.constant 0 : index
    %c0_47 = arith.constant 0 : index
    %64 = vector.load %arg13[%c0_46, %c0_47] : memref<32x32xf32, #tpu.memory_space<vmem>>, vector<32x32xf32>
    %cst_48 = arith.constant dense<0.000000e+00> : vector<1x32xf32>
    %65 = tpu.matmul %35, %64, %cst_48 {dimension_numbers = #tpu.dot_dimension_numbers<[1], [0], [0], [1], [0, 0, 1, 1], [], []>} : vector<1x32xf32>, vector<32x32xf32>, vector<1x32xf32> -> vector<1x32xf32>
    %c0_49 = arith.constant 0 : index
    %c0_50 = arith.constant 0 : index
    %66 = vector.load %arg16[%c0_49, %c0_50] : memref<1x32xf32, #tpu.memory_space<vmem>>, vector<1x32xf32>
    %67 = arith.addf %65, %66 : vector<1x32xf32>
    %c0_51 = arith.constant 0 : index
    %c0_52 = arith.constant 0 : index
    %68 = vector.load %arg19[%c0_51, %c0_52] : memref<32x32xf32, #tpu.memory_space<vmem>>, vector<32x32xf32>
    %cst_53 = arith.constant dense<0.000000e+00> : vector<1x32xf32>
    %69 = tpu.matmul %7, %68, %cst_53 {dimension_numbers = #tpu.dot_dimension_numbers<[1], [0], [0], [1], [0, 0, 1, 1], [], []>} : vector<1x32xf32>, vector<32x32xf32>, vector<1x32xf32> -> vector<1x32xf32>
    %c0_54 = arith.constant 0 : index
    %c0_55 = arith.constant 0 : index
    %70 = vector.load %arg22[%c0_54, %c0_55] : memref<1x32xf32, #tpu.memory_space<vmem>>, vector<1x32xf32>
    %71 = arith.addf %69, %70 : vector<1x32xf32>
    %72 = arith.mulf %49, %71 : vector<1x32xf32>
    %73 = arith.addf %67, %72 : vector<1x32xf32>
    %74 = math.tanh %73 : vector<1x32xf32>
    %cst_56 = arith.constant 1.000000e+00 : f32
    %75 = vector.broadcast %cst_56 : f32 to vector<1x32xf32>
    %76 = arith.subf %75, %63 : vector<1x32xf32>
    %77 = arith.mulf %76, %74 : vector<1x32xf32>
    %78 = arith.mulf %63, %7 : vector<1x32xf32>
    %79 = arith.addf %77, %78 : vector<1x32xf32>
    %c0_57 = arith.constant 0 : index
    %c0_58 = arith.constant 0 : index
    %80 = vector.load %arg28[%c0_57, %c0_58] : memref<1x32xf32, #tpu.memory_space<vmem>>, vector<1x32xf32>
    tpu.vector_store %arg28[%c0_57, %c0_58], %79 {strides = array<i32>} : memref<1x32xf32, #tpu.memory_space<vmem>>, vector<1x32xf32>,
    %c0_59 = arith.constant 0 : index
    %c0_60 = arith.constant 0 : index
    %81 = vector.load %arg23[%c0_59, %c0_60] : memref<32x64xf32, #tpu.memory_space<vmem>>, vector<32x64xf32>
    %cst_61 = arith.constant dense<0.000000e+00> : vector<1x64xf32>
    %82 = tpu.matmul %79, %81, %cst_61 {dimension_numbers = #tpu.dot_dimension_numbers<[1], [0], [0], [1], [0, 0, 1, 1], [], []>} : vector<1x32xf32>, vector<32x64xf32>, vector<1x64xf32> -> vector<1x64xf32>
    %c0_62 = arith.constant 0 : index
    %c0_63 = arith.constant 0 : index
    %83 = vector.load %arg24[%c0_62, %c0_63] : memref<1x64xf32, #tpu.memory_space<vmem>>, vector<1x64xf32>
    %84 = arith.addf %82, %83 : vector<1x64xf32>
    %cst_64 = arith.constant dense<0xFF800000> : vector<1xf32>
    %85 = vector.multi_reduction <maximumf>, %84, %cst_64 [1] : vector<1x64xf32> to vector<1xf32>
    %86 = vector.shape_cast %85 : vector<1xf32> to vector<1x1xf32>
    %87 = vector.broadcast %86 : vector<1x1xf32> to vector<1x64xf32>
    %88 = arith.subf %84, %87 : vector<1x64xf32>
    %89 = math.exp %88 : vector<1x64xf32>
    %cst_65 = arith.constant dense<0.000000e+00> : vector<1xf32>
    %90 = vector.multi_reduction <add>, %89, %cst_65 [1] : vector<1x64xf32> to vector<1xf32>
    %91 = vector.shape_cast %90 : vector<1xf32> to vector<1x1xf32>
    %92 = math.log %91 : vector<1x1xf32>
    %93 = vector.broadcast %92 : vector<1x1xf32> to vector<1x64xf32>
    %94 = arith.subf %88, %93 : vector<1x64xf32>
    %95 = arith.index_cast %arg0 : i32 to index
    %c0_66 = arith.constant 0 : index
    %96 = vector.load %arg25[%95, %c0_66] : memref<8x64xf32, #tpu.memory_space<vmem>>, vector<1x64xf32>
    tpu.vector_store %arg25[%95, %c0_66], %94 {strides = array<i32>} : memref<8x64xf32, #tpu.memory_space<vmem>>, vector<1x64xf32>,
    %97 = arith.index_cast %arg0 : i32 to index
    %c0_67 = arith.constant 0 : index
    %98 = vector.load %arg26[%97, %c0_67] : memref<8x32xf32, #tpu.memory_space<vmem>>, vector<1x32xf32>
    tpu.vector_store %arg26[%97, %c0_67], %79 {strides = array<i32>} : memref<8x32xf32, #tpu.memory_space<vmem>>, vector<1x32xf32>,
    %99 = arith.index_cast %arg0 : i32 to index
    %c0_68 = arith.constant 0 : index
    %100 = vector.load %arg27[%99, %c0_68] : memref<8x16xf32, #tpu.memory_space<vmem>>, vector<1x16xf32>
    tpu.vector_store %arg27[%99, %c0_68], %24 {strides = array<i32>} : memref<8x16xf32, #tpu.memory_space<vmem>>, vector<1x16xf32>,
    return
  }
  func.func @transform_0(%arg0: i32, %arg1: memref<8xi32, #tpu.memory_space<smem>>) -> (i32, i32) {
    %c0_i32 = arith.constant 0 : i32
    %c0_i32_0 = arith.constant 0 : i32
    %c0_i32_1 = arith.constant 0 : i32
    return %c0_i32, %c0_i32_0 : i32, i32
  }
  func.func @transform_1(%arg0: i32, %arg1: memref<8xi32, #tpu.memory_space<smem>>) -> (i32, i32) {
    %c0_i32 = arith.constant 0 : i32
    %c0_i32_0 = arith.constant 0 : i32
    %c0_i32_1 = arith.constant 0 : i32
    return %c0_i32, %c0_i32_0 : i32, i32
  }
  func.func @transform_2(%arg0: i32, %arg1: memref<8xi32, #tpu.memory_space<smem>>) -> (i32, i32) {
    %c0_i32 = arith.constant 0 : i32
    %c0_i32_0 = arith.constant 0 : i32
    %c0_i32_1 = arith.constant 0 : i32
    return %c0_i32, %c0_i32_0 : i32, i32
  }
  func.func @transform_3(%arg0: i32, %arg1: memref<8xi32, #tpu.memory_space<smem>>) -> (i32, i32) {
    %c0_i32 = arith.constant 0 : i32
    %c0_i32_0 = arith.constant 0 : i32
    %c0_i32_1 = arith.constant 0 : i32
    return %c0_i32, %c0_i32_0 : i32, i32
  }
  func.func @transform_4(%arg0: i32, %arg1: memref<8xi32, #tpu.memory_space<smem>>) -> (i32, i32) {
    %c0_i32 = arith.constant 0 : i32
    %c0_i32_0 = arith.constant 0 : i32
    %c0_i32_1 = arith.constant 0 : i32
    return %c0_i32, %c0_i32_0 : i32, i32
  }
  func.func @transform_5(%arg0: i32, %arg1: memref<8xi32, #tpu.memory_space<smem>>) -> (i32, i32) {
    %c0_i32 = arith.constant 0 : i32
    %c0_i32_0 = arith.constant 0 : i32
    %c0_i32_1 = arith.constant 0 : i32
    return %c0_i32, %c0_i32_0 : i32, i32
  }
  func.func @transform_6(%arg0: i32, %arg1: memref<8xi32, #tpu.memory_space<smem>>) -> (i32, i32) {
    %c0_i32 = arith.constant 0 : i32
    %c0_i32_0 = arith.constant 0 : i32
    %c0_i32_1 = arith.constant 0 : i32
    return %c0_i32, %c0_i32_0 : i32, i32
  }
  func.func @transform_7(%arg0: i32, %arg1: memref<8xi32, #tpu.memory_space<smem>>) -> (i32, i32) {
    %c0_i32 = arith.constant 0 : i32
    %c0_i32_0 = arith.constant 0 : i32
    %c0_i32_1 = arith.constant 0 : i32
    return %c0_i32, %c0_i32_0 : i32, i32
  }
  func.func @transform_8(%arg0: i32, %arg1: memref<8xi32, #tpu.memory_space<smem>>) -> (i32, i32) {
    %c0_i32 = arith.constant 0 : i32
    %c0_i32_0 = arith.constant 0 : i32
    %c0_i32_1 = arith.constant 0 : i32
    return %c0_i32, %c0_i32_0 : i32, i32
  }
  func.func @transform_9(%arg0: i32, %arg1: memref<8xi32, #tpu.memory_space<smem>>) -> (i32, i32) {
    %c0_i32 = arith.constant 0 : i32
    %c0_i32_0 = arith.constant 0 : i32
    %c0_i32_1 = arith.constant 0 : i32
    return %c0_i32, %c0_i32_0 : i32, i32
  }
  func.func @transform_10(%arg0: i32, %arg1: memref<8xi32, #tpu.memory_space<smem>>) -> (i32, i32) {
    %c0_i32 = arith.constant 0 : i32
    %c0_i32_0 = arith.constant 0 : i32
    %c0_i32_1 = arith.constant 0 : i32
    return %c0_i32, %c0_i32_0 : i32, i32
  }
  func.func @transform_11(%arg0: i32, %arg1: memref<8xi32, #tpu.memory_space<smem>>) -> (i32, i32) {
    %c0_i32 = arith.constant 0 : i32
    %c0_i32_0 = arith.constant 0 : i32
    %c0_i32_1 = arith.constant 0 : i32
    return %c0_i32, %c0_i32_0 : i32, i32
  }
  func.func @transform_12(%arg0: i32, %arg1: memref<8xi32, #tpu.memory_space<smem>>) -> (i32, i32) {
    %c0_i32 = arith.constant 0 : i32
    %c0_i32_0 = arith.constant 0 : i32
    %c0_i32_1 = arith.constant 0 : i32
    return %c0_i32, %c0_i32_0 : i32, i32
  }
  func.func @transform_13(%arg0: i32, %arg1: memref<8xi32, #tpu.memory_space<smem>>) -> (i32, i32) {
    %c0_i32 = arith.constant 0 : i32
    %c0_i32_0 = arith.constant 0 : i32
    %c0_i32_1 = arith.constant 0 : i32
    return %c0_i32, %c0_i32_0 : i32, i32
  }
  func.func @transform_14(%arg0: i32, %arg1: memref<8xi32, #tpu.memory_space<smem>>) -> (i32, i32) {
    %c0_i32 = arith.constant 0 : i32
    %c0_i32_0 = arith.constant 0 : i32
    %c0_i32_1 = arith.constant 0 : i32
    return %c0_i32, %c0_i32_0 : i32, i32
  }
  func.func @transform_15(%arg0: i32, %arg1: memref<8xi32, #tpu.memory_space<smem>>) -> (i32, i32) {
    %c0_i32 = arith.constant 0 : i32
    %c0_i32_0 = arith.constant 0 : i32
    %c0_i32_1 = arith.constant 0 : i32
    return %c0_i32, %c0_i32_0 : i32, i32
  }
  func.func @transform_16(%arg0: i32, %arg1: memref<8xi32, #tpu.memory_space<smem>>) -> (i32, i32) {
    %c0_i32 = arith.constant 0 : i32
    %c0_i32_0 = arith.constant 0 : i32
    %c0_i32_1 = arith.constant 0 : i32
    return %c0_i32, %c0_i32_0 : i32, i32
  }
  func.func @transform_17(%arg0: i32, %arg1: memref<8xi32, #tpu.memory_space<smem>>) -> (i32, i32) {
    %c0_i32 = arith.constant 0 : i32
    %c0_i32_0 = arith.constant 0 : i32
    %c0_i32_1 = arith.constant 0 : i32
    return %c0_i32, %c0_i32_0 : i32, i32
  }
  func.func @transform_18(%arg0: i32, %arg1: memref<8xi32, #tpu.memory_space<smem>>) -> (i32, i32) {
    %c0_i32 = arith.constant 0 : i32
    %c0_i32_0 = arith.constant 0 : i32
    %c0_i32_1 = arith.constant 0 : i32
    return %c0_i32, %c0_i32_0 : i32, i32
  }
  func.func @transform_19(%arg0: i32, %arg1: memref<8xi32, #tpu.memory_space<smem>>) -> (i32, i32) {
    %c0_i32 = arith.constant 0 : i32
    %c0_i32_0 = arith.constant 0 : i32
    %c0_i32_1 = arith.constant 0 : i32
    return %c0_i32, %c0_i32_0 : i32, i32
  }
  func.func @transform_20(%arg0: i32, %arg1: memref<8xi32, #tpu.memory_space<smem>>) -> (i32, i32) {
    %c0_i32 = arith.constant 0 : i32
    %c0_i32_0 = arith.constant 0 : i32
    %c0_i32_1 = arith.constant 0 : i32
    return %c0_i32, %c0_i32_0 : i32, i32
  }
  func.func @transform_21(%arg0: i32, %arg1: memref<8xi32, #tpu.memory_space<smem>>) -> (i32, i32) {
    %c0_i32 = arith.constant 0 : i32
    %c0_i32_0 = arith.constant 0 : i32
    %c0_i32_1 = arith.constant 0 : i32
    return %c0_i32, %c0_i32_0 : i32, i32
  }
  func.func @transform_22(%arg0: i32, %arg1: memref<8xi32, #tpu.memory_space<smem>>) -> (i32, i32) {
    %c0_i32 = arith.constant 0 : i32
    %c0_i32_0 = arith.constant 0 : i32
    %c0_i32_1 = arith.constant 0 : i32
    return %c0_i32, %c0_i32_0 : i32, i32
  }
  func.func @transform_23(%arg0: i32, %arg1: memref<8xi32, #tpu.memory_space<smem>>) -> (i32, i32) {
    %c0_i32 = arith.constant 0 : i32
    %c0_i32_0 = arith.constant 0 : i32
    %c0_i32_1 = arith.constant 0 : i32
    return %c0_i32, %c0_i32_0 : i32, i32
  }
  func.func @transform_24(%arg0: i32, %arg1: memref<8xi32, #tpu.memory_space<smem>>) -> (i32, i32) {
    %c0_i32 = arith.constant 0 : i32
    %c0_i32_0 = arith.constant 0 : i32
    %c0_i32_1 = arith.constant 0 : i32
    return %c0_i32, %c0_i32_0 : i32, i32
  }
  func.func @transform_25(%arg0: i32, %arg1: memref<8xi32, #tpu.memory_space<smem>>) -> (i32, i32) {
    %c0_i32 = arith.constant 0 : i32
    %c0_i32_0 = arith.constant 0 : i32
    %c0_i32_1 = arith.constant 0 : i32
    return %c0_i32, %c0_i32_0 : i32, i32
  }
}

</mosaic_0001>

<bundles_post_ra>
// kernel: attn_decoder_decode.1
= control target key start
LH: loop header
LB: loop body
LE: loop exit
PB: predicated region body
PF: predicated region fallthrough
CT: control target
= control target key end

     0   :  { %s3825_s0 = inlined_call_operand.vmem [shape: s32[8], index: 0, kind: input, shape index: {}]   ;;  %s3826_s1 = inlined_call_operand.hbm [shape: f32[64,32], index: 1, kind: input, shape index: {}]   ;;  %s3827_s2 = inlined_call_operand.hbm [shape: f32[16,32], index: 2, kind: input, shape index: {}]   ;;  %s3828_s3 = inlined_call_operand.vmem [shape: f32[1,32], index: 3, kind: input, shape index: {}]   ;;  %s3829_s4 = inlined_call_operand.hbm [shape: f32[32,16], index: 4, kind: input, shape index: {}]   ;;  %s3830_s5 = inlined_call_operand.hbm [shape: f32[32,16], index: 5, kind: input, shape index: {}]   ;;  %s3831_s6 = inlined_call_operand.hbm [shape: f32[1,16], index: 6, kind: input, shape index: {}]   ;;  %s3832_s7 = inlined_call_operand.hbm [shape: f32[32,32], index: 7, kind: input, shape index: {}]   ;;  %s3833_s8 = inlined_call_operand.hbm [shape: f32[32,32], index: 8, kind: input, shape index: {}]   ;;  %s3834_s9 = inlined_call_operand.hbm [shape: f32[1,32], index: 9, kind: input, shape index: {}]   ;;  %s3835_s10 = inlined_call_operand.hbm [shape: f32[32,32], index: 10, kind: input, shape index: {}]   ;;  %s3836_s11 = inlined_call_operand.hbm [shape: f32[32,32], index: 11, kind: input, shape index: {}]   ;;  %s3837_s12 = inlined_call_operand.hbm [shape: f32[32,32], index: 12, kind: input, shape index: {}]   ;;  %s3838_s13 = inlined_call_operand.hbm [shape: f32[1,32], index: 13, kind: input, shape index: {}]   ;;  %s3839_s14 = inlined_call_operand.hbm [shape: f32[1,32], index: 14, kind: input, shape index: {}]   ;;  %s3840_s15 = inlined_call_operand.vmem [shape: f32[1,32], index: 15, kind: input, shape index: {}]   ;;  %s3841_s16 = inlined_call_operand.hbm [shape: f32[32,32], index: 16, kind: input, shape index: {}]   ;;  %s3842_s17 = inlined_call_operand.hbm [shape: f32[32,32], index: 17, kind: input, shape index: {}]   ;;  %s3843_s18 = inlined_call_operand.vmem [shape: f32[32,32], index: 18, kind: input, shape index: {}]   ;;  %s3844_s19 = inlined_call_operand.vmem [shape: f32[1,32], index: 19, kind: input, shape index: {}]   ;;  %s3845_s20 = inlined_call_operand.vmem [shape: f32[1,32], index: 20, kind: input, shape index: {}]   ;;  %s3846_s21 = inlined_call_operand.vmem [shape: f32[1,32], index: 21, kind: input, shape index: {}]   ;;  %s3847_s22 = inlined_call_operand.hbm [shape: f32[32,64], index: 22, kind: input, shape index: {}]   ;;  %s3848_s23 = inlined_call_operand.hbm [shape: f32[1,64], index: 23, kind: input, shape index: {}]   ;;  %s3849_s24 = inlined_call_operand.hbm [shape: f32[8,64], index: 24, kind: output, shape index: {0}]   ;;  %s3850_s25 = inlined_call_operand.hbm [shape: f32[8,32], index: 25, kind: output, shape index: {1}]   ;;  %s3851_s26 = inlined_call_operand.hbm [shape: f32[8,16], index: 26, kind: output, shape index: {2}]  }
   0x1   :  { %3858 = sst [smem:[#allocation48_spill]] %s3825_s0 }
   0x2   :  { %3859 = sst [smem:[#allocation49_spill]] %s3826_s1 }
   0x3   :  { %3860 = sst [smem:[#allocation50_spill]] %s3827_s2 }
   0x4   :  { %3861 = sst [smem:[#allocation51_spill]] %s3828_s3 }
   0x5   :  { %3862 = sst [smem:[#allocation52_spill]] %s3829_s4 }
   0x6   :  { %3863 = sst [smem:[#allocation53_spill]] %s3830_s5 }
   0x7   :  { %3864 = sst [smem:[#allocation54_spill]] %s3831_s6 }
   0x8   :  { %3865 = sst [smem:[#allocation55_spill]] %s3832_s7 }
   0x9   :  { %3866 = sst [smem:[#allocation56_spill]] %s3833_s8 }
   0xa   :  { %3867 = sst [smem:[#allocation57_spill]] %s3834_s9 }
   0xb   :  { %3868 = sst [smem:[#allocation58_spill]] %s3835_s10 }
   0xc   :  { %3869 = sst [smem:[#allocation59_spill]] %s3836_s11 }
   0xd   :  { %3870 = sst [smem:[#allocation60_spill]] %s3840_s15 }
   0xe   :  { %s3871_s7 = sld [smem:[#allocation48_spill]] }
  0x14   :  { %s32_s15 = sshll.u32 %s3871_s7, 4  ;;  %s33_s15 = int_to_ptr.vmem [resolvable:$true] %s32_s15 }
  0x15   :  { %s2682_s28 = scalar_lea.vmem %s33_s15, 16  ;;  %p2687_p1 = scmp.lt.s32.totalorder %s33_s15, %s33_s15 }
  0x16   :  { %p2683_p0 = scmp.ne.s32.totalorder %s33_s15, %s2682_s28  ;;  %p2688_p2 = scmp.lt.s32.totalorder %s2682_s28, %s2682_s28 }
  0x18   :  { %p2689_p3 = por %p2688_p2, %p2687_p1 }
  0x1a   :  { %p2690_p4 = pnand %p2689_p3, %p2683_p0 }
  0x1c   :  { %2693 = shalt.err (!%p2690_p4)  }
  0x1d   :  { %s3262_s8 = smov [#allocation4]  }
  0x1e   :  { %35 = dma.vmem_to_smem %s33_s15, 16, %s3262_s8, [#allocation3] }
  0x1f   :  { %3212 = dma.done.wait [#allocation3], 16 }
  0x20   :  { %3213 = vsyncadd [#allocation3], 4294967280 }
  0x21   :  { %37 = sfence }
  0x22   :  { %38 = vsyncpa [#allocation6], 0 }
  0x23   :  { %39 = vsyncpa [#allocation9], 0 }
  0x24   :  { %40 = vsyncpa [#allocation12], 0 }
  0x25   :  { %41 = vsyncpa [#allocation15], 0 }
  0x26   :  { %42 = vsyncpa [#allocation18], 0 }
  0x27   :  { %43 = vsyncpa [#allocation21], 0 }
  0x28   :  { %44 = vsyncpa [#allocation24], 0 }
  0x29   :  { %45 = vsyncpa [#allocation27], 0 }
  0x2a   :  { %46 = vsyncpa [#allocation30], 0 }
  0x2b   :  { %47 = vsyncpa [#allocation7], 0 }
  0x2c   :  { %48 = vsyncpa [#allocation34], 0  ;;  %s3425_s4 = smov 0  }
  0x2d LB: > { %s3431_s15 = sadd.s32 4294967295, %s3260_s4   ;;  %p2202_p5 = scmp.ge.s32.totalorder %s3260_s4, 1  ;;  %s3260_s4 = sphi %s3425_s4, %s54_s4  }
  0x2e   : > { %p605_p6 = scmp.lt.s32.totalorder %s3260_s4, 9  ;;  %p3856_p8 = scmp.eq.s32.totalorder %s3431_s15, 0 }
  0x2f   : > { %s3263_s0 = smov [#allocation8]   ;;  %s3264_s30 = smov [#allocation11]  }
  0x30   : > { %p3437_p9 = pnand %p2202_p5, %p605_p6  ;;  %s630_s9 = sshll.u32 %s3263_s0, 4  ;;  %s631_s9 = int_to_ptr.vmem [resolvable:$true] %s630_s9 }
  0x31   : > { %s659_s2 = sshll.u32 %s3264_s30, 4  ;;  %s3265_s10 = smov [#allocation14]   ;;  %s3443_s2 = int_to_ptr.vmem [resolvable:$true] %s659_s2 }
  0x32   : > { %s3872_s29 = scalar_select %p3437_p9, 1, 0 }
  0x33   : > { %p2539_p10 = pneg %p3437_p9  ;;  %s683_s6 = sshll.u32 %s3265_s10, 4  ;;  %s3451_s6 = int_to_ptr.vmem [resolvable:$true] %s683_s6 }
  0x34   : > { %s3266_s1 = smov [#allocation17]   ;;  %s2705_s7 = scalar_lea.vmem %s631_s9, 256 }
  0x35   : > { %p3447_p11 = pnand %p3856_p8, %p2539_p10  ;;  %s3453_s27 = sshll.u32 %s3266_s1, 4  ;;  %s711_s27 = int_to_ptr.vmem [resolvable:$true] %s3453_s27 }
  0x36   : > { %p2706_p13 = scmp.ne.s32.totalorder %s631_s9, %s2705_s7  ;;  %p2713_p2 = scmp.lt.s32.totalorder %s631_s9, %s631_s9 }
  0x37   : > { %p3457_p12 = pneg %p3447_p11  ;;  %p2714_p3 = scmp.lt.s32.totalorder %s2705_s7, %s2705_s7 }
  0x39   : > { %p2708_p0 = pnand %p2706_p13, %p3457_p12  ;;  %p2715_p4 = por %p2714_p3, %p2713_p2 }
  0x3b   : > { %p2709_p1 = pneg %p2708_p0 }
  0x3d   : > { %p2716_p5 = pnand %p2715_p4, %p2709_p1 }
  0x3f   : > { %2719 = shalt.err (!%p2716_p5)
}
  0x40   : > { %s3852_s28 = smov 128   ;;  %s3854_s8 = smov 8  }
  0x41   : > { %s3875_s10 = sld [smem:[#allocation50_spill]]  ;;  %s2731_s1 = scalar_lea.vmem %s3443_s2, 512 }
  0x42   : > { %p2732_p6 = scmp.ne.s32.totalorder %s3443_s2, %s2731_s1  ;;  %p2739_p0 = scmp.lt.s32.totalorder %s3443_s2, %s3443_s2 }
  0x43   : > { %p2740_p1 = scmp.lt.s32.totalorder %s2731_s1, %s2731_s1 }
  0x44   : > { %p2734_p10 = pnand %p2732_p6, %p3457_p12 }
  0x45   : > { %p2741_p2 = por %p2740_p1, %p2739_p0 }
  0x46   : > { %p2735_p13 = pneg %p2734_p10 }
  0x47   : > { %2545 = dma.hbm_to_vmem [thread:$0]  (!%p3447_p11), %s3875_s10, 256, %s631_s9, [#allocation9], %s3852_s28, %s3852_s28, %s3854_s8  }
  0x48   : > { %p2742_p3 = pnand %p2741_p2, %p2735_p13 }
  0x4a   : > { %2745 = shalt.err (!%p2742_p3)
}
  0x4b   : > { %s3876_s9 = sld [smem:[#allocation53_spill]]  ;;  %s2757_s30 = scalar_lea.vmem %s3451_s6, 512 }
  0x4c   : > { %p2758_p4 = scmp.ne.s32.totalorder %s3451_s6, %s2757_s30  ;;  %p2765_p10 = scmp.lt.s32.totalorder %s3451_s6, %s3451_s6 }
  0x4d   : > { %p2766_p13 = scmp.lt.s32.totalorder %s2757_s30, %s2757_s30 }
  0x4e   : > { %p2760_p5 = pnand %p2758_p4, %p3457_p12 }
  0x4f   : > { %p2767_p0 = por %p2766_p13, %p2765_p10 }
  0x50   : > { %p2761_p6 = pneg %p2760_p5 }
  0x51   : > { %2551 = dma.hbm_to_vmem [thread:$0]  (!%p3447_p11), %s3876_s9, 512, %s3443_s2, [#allocation12], %s3852_s28, %s3852_s28, %s3854_s8  }
  0x52   : > { %p2768_p1 = pnand %p2767_p0, %p2761_p6 }
  0x54   : > { %2771 = shalt.err (!%p2768_p1)
}
  0x55   : > { %s3877_s2 = sld [smem:[#allocation55_spill]]  ;;  %s2783_s7 = scalar_lea.vmem %s711_s27, 16 }
  0x56   : > { %p2784_p2 = scmp.ne.s32.totalorder %s711_s27, %s2783_s7  ;;  %s2790_s0 = scalar_lea.vmem %s711_s27, 32 }
  0x57   : > { %p2791_p5 = scmp.lt.s32.totalorder %s711_s27, %s711_s27  ;;  %p2792_p6 = scmp.lt.s32.totalorder %s2790_s0, %s2783_s7 }
  0x58   : > { %p2786_p3 = pnand %p2784_p2, %p3457_p12 }
  0x59   : > { %p2793_p10 = por %p2792_p6, %p2791_p5 }
  0x5a   : > { %p2787_p4 = pneg %p2786_p3 }
  0x5b   : > { %2557 = dma.hbm_to_vmem [thread:$0]  (!%p3447_p11), %s3877_s2, 512, %s3451_s6, [#allocation15], %s3852_s28, %s3852_s28, %s3854_s8  }
  0x5c   : > { %p2794_p13 = pnand %p2793_p10, %p2787_p4 }
  0x5e   : > { %2797 = shalt.err (!%p2794_p13)
}
  0x5f   : > { %s3878_s10 = sld [smem:[#allocation57_spill]]  ;;  %s3269_s6 = smov [#allocation20]  }
  0x60   : > { %s733_s1 = sshll.u32 %s3269_s6, 4  ;;  %s3270_s2 = smov [#allocation23]   ;;  %s734_s1 = int_to_ptr.vmem [resolvable:$true] %s733_s1 }
  0x61   : > { %s760_s28 = sshll.u32 %s3270_s2, 4  ;;  %s2809_s8 = scalar_lea.vmem %s734_s1, 512  ;;  %s761_s28 = int_to_ptr.vmem [resolvable:$true] %s760_s28 }
  0x62   : > { %p2810_p0 = scmp.ne.s32.totalorder %s734_s1, %s2809_s8  ;;  %p2817_p3 = scmp.lt.s32.totalorder %s734_s1, %s734_s1 }
  0x63   : > { %p2818_p4 = scmp.lt.s32.totalorder %s2809_s8, %s2809_s8 }
  0x64   : > { %p2812_p1 = pnand %p2810_p0, %p3457_p12 }
  0x65   : > { %2563 = dma.hbm_to_vmem [thread:$0]  (!%p3447_p11), %s3878_s10, 16, %s711_s27, [#allocation18]  }
  0x66   : > { %p2813_p2 = pneg %p2812_p1  ;;  %p2819_p5 = por %p2818_p4, %p2817_p3 }
  0x68   : > { %p2820_p6 = pnand %p2819_p5, %p2813_p2 }
  0x6a   : > { %2823 = shalt.err (!%p2820_p6)
}
  0x6b   : > { %s3879_s7 = smov 8   ;;  %s3880_s0 = smov 128  }
  0x6c   : > { %s3881_s11 = sld [smem:[#allocation59_spill]]  ;;  %s2835_s30 = scalar_lea.vmem %s761_s28, 16 }
  0x6d   : > { %p2836_p10 = scmp.ne.s32.totalorder %s761_s28, %s2835_s30  ;;  %s2842_s8 = scalar_lea.vmem %s761_s28, 32 }
  0x6e   : > { %p2843_p1 = scmp.lt.s32.totalorder %s761_s28, %s761_s28  ;;  %p2844_p2 = scmp.lt.s32.totalorder %s2842_s8, %s2835_s30 }
  0x6f   : > { %p2838_p13 = pnand %p2836_p10, %p3457_p12 }
  0x70   : > { %p2845_p3 = por %p2844_p2, %p2843_p1 }
  0x71   : > { %p2839_p0 = pneg %p2838_p13 }
  0x72   : > { %2569 = dma.hbm_to_vmem [thread:$0]  (!%p3447_p11), %s3881_s11, 512, %s734_s1, [#allocation21], %s3880_s0, %s3880_s0, %s3879_s7  }
  0x73   : > { %p2846_p4 = pnand %p2845_p3, %p2839_p0 }
  0x75   : > { %2849 = shalt.err (!%p2846_p4)
}
  0x76   : > { %2575 = dma.hbm_to_vmem [thread:$0]  (!%p3447_p11), %s3838_s13, 16, %s761_s28, [#allocation24]  }
  0x77   : > { %s3271_s1 = smov [#allocation26]   ;;  %s3272_s27 = smov [#allocation29]  }
  0x78   : > { %s784_s2 = sshll.u32 %s3271_s1, 4  ;;  %s822_s9 = sshll.u32 %s3272_s27, 4  ;;  %s785_s2 = int_to_ptr.vmem [resolvable:$true] %s784_s2  ;;  %s823_s9 = int_to_ptr.vmem [resolvable:$true] %s822_s9 }
  0x79   : > { %s2861_s11 = scalar_lea.vmem %s785_s2, 512  ;;  %p2869_p13 = scmp.lt.s32.totalorder %s785_s2, %s785_s2 }
  0x7a   : > { %p2862_p5 = scmp.ne.s32.totalorder %s785_s2, %s2861_s11  ;;  %p2870_p0 = scmp.lt.s32.totalorder %s2861_s11, %s2861_s11 }
  0x7c   : > { %p2864_p6 = pnand %p2862_p5, %p3457_p12  ;;  %p2871_p1 = por %p2870_p0, %p2869_p13 }
  0x7e   : > { %p2865_p10 = pneg %p2864_p6 }
  0x80   : > { %p2872_p2 = pnand %p2871_p1, %p2865_p10 }
  0x82   : > { %2875 = shalt.err (!%p2872_p2)
}
  0x83   : > { %2581 = dma.hbm_to_vmem [thread:$0]  (!%p3447_p11), %s3841_s16, 512, %s785_s2, [#allocation27], %s3880_s0, %s3880_s0, %s3879_s7  }
  0x84   : > { %s2887_s8 = scalar_lea.vmem %s823_s9, 512  ;;  %p2895_p6 = scmp.lt.s32.totalorder %s823_s9, %s823_s9 }
  0x85   : > { %p2888_p3 = scmp.ne.s32.totalorder %s823_s9, %s2887_s8  ;;  %p2896_p13 = scmp.lt.s32.totalorder %s2887_s8, %s2887_s8 }
  0x87   : > { %p2890_p4 = pnand %p2888_p3, %p3457_p12  ;;  %p2897_p10 = por %p2896_p13, %p2895_p6 }
  0x89   : > { %p2891_p5 = pneg %p2890_p4 }
  0x8b   : > { %p2898_p0 = pnand %p2897_p10, %p2891_p5 }
  0x8d   : > { %2901 = shalt.err (!%p2898_p0)
}
  0x8e   : > { %2587 = dma.hbm_to_vmem [thread:$0]  (!%p3447_p11), %s3847_s22, 512, %s823_s9, [#allocation30], %s3880_s0, %s3880_s0, %s3879_s7  }
  0x8f   : > { %s3273_s6 = smov [#allocation5]   ;;  %s3274_s2 = smov [#allocation10]  }
  0x90   : > { %s617_s1 = sshll.u32 %s3273_s6, 4  ;;  %s646_s27 = sshll.u32 %s3274_s2, 4  ;;  %s618_s1 = int_to_ptr.vmem [resolvable:$true] %s617_s1  ;;  %s647_s27 = int_to_ptr.vmem [resolvable:$true] %s646_s27 }
  0x91   : > { %s2913_s28 = scalar_lea.vmem %s618_s1, 1024  ;;  %p2921_p4 = scmp.lt.s32.totalorder %s618_s1, %s618_s1 }
  0x92   : > { %p2914_p1 = scmp.ne.s32.totalorder %s618_s1, %s2913_s28  ;;  %p2922_p5 = scmp.lt.s32.totalorder %s2913_s28, %s2913_s28 }
  0x94   : > { %p2916_p2 = pnand %p2914_p1, %p3457_p12  ;;  %p2923_p6 = por %p2922_p5, %p2921_p4 }
  0x96   : > { %p2917_p3 = pneg %p2916_p2 }
  0x98   : > { %p2924_p13 = pnand %p2923_p6, %p2917_p3 }
  0x9a   : > { %2927 = shalt.err (!%p2924_p13)
}
  0x9b   : > { %s3882_s8 = sld [smem:[#allocation49_spill]]  ;;  %s2939_s11 = scalar_lea.vmem %s647_s27, 512 }
  0x9c   : > { %p2940_p10 = scmp.ne.s32.totalorder %s647_s27, %s2939_s11  ;;  %p2947_p2 = scmp.lt.s32.totalorder %s647_s27, %s647_s27 }
  0x9d   : > { %p2948_p4 = scmp.lt.s32.totalorder %s2939_s11, %s2939_s11 }
  0x9e   : > { %p2942_p0 = pnand %p2940_p10, %p3457_p12 }
  0x9f   : > { %p2949_p3 = por %p2948_p4, %p2947_p2 }
  0xa0   : > { %p2943_p1 = pneg %p2942_p0 }
  0xa1   : > { %2542 = dma.hbm_to_vmem [thread:$0]  (!%p3447_p11), %s3882_s8, 1024, %s618_s1, [#allocation6], %s3880_s0, %s3880_s0, %s3879_s7  }
  0xa2   : > { %p2950_p5 = pnand %p2949_p3, %p2943_p1 }
  0xa4   : > { %2953 = shalt.err (!%p2950_p5)
}
  0xa5   : > { %s3883_s2 = sld [smem:[#allocation52_spill]]  ;;  %s3275_s1 = smov [#allocation13]  }
  0xa6   : > { %s673_s28 = sshll.u32 %s3275_s1, 4  ;;  %s3276_s9 = smov [#allocation16]   ;;  %s674_s28 = int_to_ptr.vmem [resolvable:$true] %s673_s28 }
  0xa7   : > { %s696_s30 = sshll.u32 %s3276_s9, 4  ;;  %s2965_s8 = scalar_lea.vmem %s674_s28, 16  ;;  %s697_s30 = int_to_ptr.vmem [resolvable:$true] %s696_s30 }
  0xa8   : > { %p2966_p6 = scmp.ne.s32.totalorder %s674_s28, %s2965_s8  ;;  %s2972_s11 = scalar_lea.vmem %s674_s28, 32 }
  0xa9   : > { %p2973_p0 = scmp.lt.s32.totalorder %s674_s28, %s674_s28  ;;  %p2974_p1 = scmp.lt.s32.totalorder %s2972_s11, %s2965_s8 }
  0xaa   : > { %p2968_p13 = pnand %p2966_p6, %p3457_p12 }
  0xab   : > { %2548 = dma.hbm_to_vmem [thread:$0]  (!%p3447_p11), %s3883_s2, 512, %s647_s27, [#allocation9], %s3880_s0, %s3880_s0, %s3879_s7  }
  0xac   : > { %p2969_p10 = pneg %p2968_p13  ;;  %p2975_p2 = por %p2974_p1, %p2973_p0 }
  0xae   : > { %p2976_p4 = pnand %p2975_p2, %p2969_p10 }
  0xb0   : > { %2979 = shalt.err (!%p2976_p4)
}
  0xb1   : > { %s3884_s6 = sld [smem:[#allocation54_spill]]  ;;  %s2991_s2 = scalar_lea.vmem %s697_s30, 512 }
  0xb2   : > { %p2992_p3 = scmp.ne.s32.totalorder %s697_s30, %s2991_s2  ;;  %p2999_p13 = scmp.lt.s32.totalorder %s697_s30, %s697_s30 }
  0xb3   : > { %p3000_p7 = scmp.lt.s32.totalorder %s2991_s2, %s2991_s2 }
  0xb4   : > { %p2994_p5 = pnand %p2992_p3, %p3457_p12 }
  0xb5   : > { %p3001_p8 = por %p3000_p7, %p2999_p13 }
  0xb6   : > { %p2995_p6 = pneg %p2994_p5 }
  0xb7   : > { %2554 = dma.hbm_to_vmem [thread:$0]  (!%p3447_p11), %s3884_s6, 16, %s674_s28, [#allocation12]  }
  0xb8   : > { %p3002_p9 = pnand %p3001_p8, %p2995_p6 }
  0xba   : > { %3005 = shalt.err (!%p3002_p9)
}
  0xbb   : > { %s3885_s8 = sld [smem:[#allocation56_spill]]  ;;  %s3277_s28 = smov [#allocation19]  }
  0xbc   : > { %s720_s11 = sshll.u32 %s3277_s28, 4  ;;  %s3278_s10 = smov [#allocation22]   ;;  %s721_s11 = int_to_ptr.vmem [resolvable:$true] %s720_s11 }
  0xbd   : > { %s746_s27 = sshll.u32 %s3278_s10, 4  ;;  %s3017_s6 = scalar_lea.vmem %s721_s11, 512  ;;  %s747_s27 = int_to_ptr.vmem [resolvable:$true] %s746_s27 }
  0xbe   : > { %p3018_p10 = scmp.ne.s32.totalorder %s721_s11, %s3017_s6  ;;  %p3025_p9 = scmp.lt.s32.totalorder %s721_s11, %s721_s11 }
  0xbf   : > { %p3026_p0 = scmp.lt.s32.totalorder %s3017_s6, %s3017_s6 }
  0xc0   : > { %p3020_p7 = pnand %p3018_p10, %p3457_p12 }
  0xc1   : > { %2560 = dma.hbm_to_vmem [thread:$0]  (!%p3447_p11), %s3885_s8, 512, %s697_s30, [#allocation15], %s3880_s0, %s3880_s0, %s3879_s7  }
  0xc2   : > { %p3021_p8 = pneg %p3020_p7  ;;  %p3027_p1 = por %p3026_p0, %p3025_p9 }
  0xc4   : > { %p3028_p2 = pnand %p3027_p1, %p3021_p8 }
  0xc6   : > { %3031 = shalt.err (!%p3028_p2)
}
  0xc7   : > { %s3886_s1 = sld [smem:[#allocation58_spill]]  ;;  %s3043_s9 = scalar_lea.vmem %s747_s27, 512 }
  0xc8   : > { %p3044_p4 = scmp.ne.s32.totalorder %s747_s27, %s3043_s9  ;;  %p3051_p6 = scmp.lt.s32.totalorder %s747_s27, %s747_s27 }
  0xc9   : > { %p3052_p13 = scmp.lt.s32.totalorder %s3043_s9, %s3043_s9 }
  0xca   : > { %p3046_p3 = pnand %p3044_p4, %p3457_p12 }
  0xcb   : > { %p3053_p10 = por %p3052_p13, %p3051_p6 }
  0xcc   : > { %p3047_p5 = pneg %p3046_p3 }
  0xcd   : > { %2566 = dma.hbm_to_vmem [thread:$0]  (!%p3447_p11), %s3886_s1, 512, %s721_s11, [#allocation18], %s3880_s0, %s3880_s0, %s3879_s7  }
  0xce   : > { %p3054_p7 = pnand %p3053_p10, %p3047_p5 }
  0xd0   : > { %3057 = shalt.err (!%p3054_p7)
}
  0xd1   : > { %2572 = dma.hbm_to_vmem [thread:$0]  (!%p3447_p11), %s3837_s12, 512, %s747_s27, [#allocation21], %s3880_s0, %s3880_s0, %s3879_s7  }
  0xd2   : > { %s3279_s11 = smov [#allocation25]   ;;  %s3280_s6 = smov [#allocation28]  }
  0xd3   : > { %s771_s10 = sshll.u32 %s3279_s11, 4  ;;  %s797_s30 = sshll.u32 %s3280_s6, 4  ;;  %s772_s10 = int_to_ptr.vmem [resolvable:$true] %s771_s10  ;;  %s798_s30 = int_to_ptr.vmem [resolvable:$true] %s797_s30 }
  0xd4   : > { %s3069_s2 = scalar_lea.vmem %s772_s10, 16  ;;  %s3076_s1 = scalar_lea.vmem %s772_s10, 32 }
  0xd5   : > { %p3070_p8 = scmp.ne.s32.totalorder %s772_s10, %s3069_s2  ;;  %p3077_p1 = scmp.lt.s32.totalorder %s772_s10, %s772_s10 }
  0xd6   : > { %p3078_p2 = scmp.lt.s32.totalorder %s3076_s1, %s3069_s2 }
  0xd7   : > { %p3072_p9 = pnand %p3070_p8, %p3457_p12 }
  0xd8   : > { %p3079_p4 = por %p3078_p2, %p3077_p1 }
  0xd9   : > { %p3073_p0 = pneg %p3072_p9 }
  0xdb   : > { %p3080_p3 = pnand %p3079_p4, %p3073_p0 }
  0xdd   : > { %3083 = shalt.err (!%p3080_p3)
}
  0xde   : > { %2578 = dma.hbm_to_vmem [thread:$0]  (!%p3447_p11), %s3839_s14, 16, %s772_s10, [#allocation24]  }
  0xdf   : > { %s3095_s8 = scalar_lea.vmem %s798_s30, 512  ;;  %p3103_p10 = scmp.lt.s32.totalorder %s798_s30, %s798_s30 }
  0xe0   : > { %p3096_p5 = scmp.ne.s32.totalorder %s798_s30, %s3095_s8  ;;  %p3104_p7 = scmp.lt.s32.totalorder %s3095_s8, %s3095_s8 }
  0xe2   : > { %p3098_p6 = pnand %p3096_p5, %p3457_p12  ;;  %p3105_p8 = por %p3104_p7, %p3103_p10 }
  0xe4   : > { %p3099_p13 = pneg %p3098_p6 }
  0xe6   : > { %p3106_p9 = pnand %p3105_p8, %p3099_p13 }
  0xe8   : > { %3109 = shalt.err (!%p3106_p9)
}
  0xe9   : > { %2584 = dma.hbm_to_vmem [thread:$0]  (!%p3447_p11), %s3842_s17, 512, %s798_s30, [#allocation27], %s3880_s0, %s3880_s0, %s3879_s7  }
  0xea   : > { %s3281_s10 = smov [#allocation31]  }
  0xeb   : > { %s836_s6 = sshll.u32 %s3281_s10, 4  ;;  %s837_s6 = int_to_ptr.vmem [resolvable:$true] %s836_s6 }
  0xec   : > { %s3121_s2 = scalar_lea.vmem %s837_s6, 16  ;;  %s3128_s1 = scalar_lea.vmem %s837_s6, 32 }
  0xed   : > { %p3122_p0 = scmp.ne.s32.totalorder %s837_s6, %s3121_s2  ;;  %p3129_p4 = scmp.lt.s32.totalorder %s837_s6, %s837_s6 }
  0xee   : > { %p3130_p3 = scmp.lt.s32.totalorder %s3128_s1, %s3121_s2 }
  0xef   : > { %p3124_p1 = pnand %p3122_p0, %p3457_p12 }
  0xf0   : > { %p3131_p5 = por %p3130_p3, %p3129_p4 }
  0xf1   : > { %p3125_p2 = pneg %p3124_p1 }
  0xf3   : > { %p3132_p6 = pnand %p3131_p5, %p3125_p2 }
  0xf5   : > { %3135 = shalt.err (!%p3132_p6)
}
  0xf6   : > { %2590 = dma.hbm_to_vmem [thread:$0]  (!%p3447_p11), %s3848_s23, 16, %s837_s6, [#allocation30]  }
  0xf7   : > { %p3887_p13 = scmp.ne.s32.totalorder %s3872_s29, 0 }
  0xf8   : > { %p3888_p10 = scmp.eq.s32.totalorder (!%p3887_p13), %s3431_s15, 0 }
  0xf9   : > { %849 = sbr.rel (%p3887_p13) target bundleno = 1968 (0x7b0), region = 112 }
  0xfe   : > { %3215 = dma.done.wait (%p3888_p10), [#allocation6], 1024   ;;  %p3889_p12 = pmov %p3888_p10 }
  0xff   : > { %p3890_p7 = pmov %p3888_p10 }
 0x100   : > { %3217 = vsyncadd (%p3889_p12), [#allocation6], 4294966272 }
 0x101   : > { %3219 = dma.done.wait (%p3890_p7), [#allocation9], 768   ;;  %p3891_p8 = pmov %p3890_p7 }
 0x102   : > { %p3892_p9 = pmov %p3890_p7 }
 0x103   : > { %3221 = vsyncadd (%p3891_p8), [#allocation9], 4294966528 }
 0x104   : > { %3223 = dma.done.wait (%p3892_p9), [#allocation12], 528   ;;  %p3893_p11 = pmov %p3890_p7 }
 0x105   : > { %p3894_p0 = pmov %p3890_p7 }
 0x106   : > { %3225 = vsyncadd (%p3893_p11), [#allocation12], 4294966768 }
 0x107   : > { %3227 = dma.done.wait (%p3894_p0), [#allocation15], 1024   ;;  %p3895_p1 = pmov %p3894_p0 }
 0x108   : > { %p3896_p2 = pmov %p3894_p0 }
 0x109   : > { %3229 = vsyncadd (%p3895_p1), [#allocation15], 4294966272 }
 0x10a   : > { %3231 = dma.done.wait (%p3896_p2), [#allocation18], 528   ;;  %p3897_p4 = pmov %p3894_p0 }
 0x10b   : > { %p3898_p3 = pmov %p3894_p0 }
 0x10c   : > { %3233 = vsyncadd (%p3897_p4), [#allocation18], 4294966768 }
 0x10d   : > { %3235 = dma.done.wait (%p3898_p3), [#allocation21], 1024   ;;  %p3899_p5 = pmov %p3894_p0 }
 0x10e   : > { %p3900_p6 = pmov %p3894_p0 }
 0x10f   : > { %3237 = vsyncadd (%p3899_p5), [#allocation21], 4294966272 }
 0x110   : > { %3239 = dma.done.wait (%p3900_p6), [#allocation24], 32   ;;  %p3901_p13 = pmov %p3894_p0 }
 0x111   : > { %p3902_p10 = pmov %p3894_p0 }
 0x112   : > { %3241 = vsyncadd (%p3901_p13), [#allocation24], 4294967264 }
 0x113   : > { %3243 = dma.done.wait (%p3902_p10), [#allocation27], 1024   ;;  %p3903_p12 = pmov %p3894_p0 }
 0x114   : > { %p3904_p7 = pmov %p3894_p0 }
 0x115   : > { %3245 = vsyncadd (%p3903_p12), [#allocation27], 4294966272 }
 0x116   : > { %3247 = dma.done.wait (%p3904_p7), [#allocation30], 528   ;;  %p3905_p8 = pmov %p3894_p0 }
 0x117   : > { %p3906_p9 = scmp.ne.s32.totalorder %s3431_s15, 0 }
 0x118   : > { %3249 = vsyncadd (%p3905_p8), [#allocation30], 4294966768  ;;  %s3907_s3 = sld [smem:[#allocation51_spill]] (!%p3906_p9) }
 0x119   : > { %974 = sbr.rel (%p3906_p9) target bundleno = 288 (0x120), region = 184 }
 0x11e   : > { %v975_v0 = vld [vmem:[%s3907_s3] sm:$0x1]  ;;  %vm976_vm0 = vcmask 253952  }
 0x11f   : > { %977 = vst.msk [vmem:[#allocation2] sm:$0x1] %vm976_vm0, %v975_v0 }
 0x120 PF: > { %v989_v1 = vld [vmem:[#allocation11 + $0x18] sm:$0xff]  ;;  %v3282_v3 = vmov 0.0   ;;  %v988_v4 = vld [vmem:[#allocation11 + $0x10] sm:$0xff]  ;;  %s978_s7 = sld [smem:[#allocation4 + %s3431_s15]]  ;;  %v987_v6 = vld [vmem:[#allocation11 + $0x8] sm:$0xff]  ;;  %vm990_vm1 = vcmask 261120  }
 0x121   : > { %v985_v2 = vld [vmem:[#allocation10 + $0x18] sm:$0xff]  ;;  %2331 = vmatprep.subr.mxu0 %v3282_v3  ;;  %2342 = vmatprep.subr.mxu1 %v3282_v3  ;;  %v984_v5 = vld [vmem:[#allocation10 + $0x10] sm:$0xff]  ;;  %v983_v7 = vld [vmem:[#allocation10 + $0x8] sm:$0xff]  ;;  %vm3283_vm2 = vmmov 0   ;;  %vm1139_vm3 = vcmask 122880   ;;  %vm1153_vm4 = vcmask 130048  }
 0x122   : > { %2332 = vmatpush3.msra.mxu0 %v989_v1  ;;  %2343 = vmatpush3.msra.mxu1 %v985_v2  ;;  %v986_v8 = vld [vmem:[#allocation11] sm:$0xff]  ;;  %v1152_v25 = vld [vmem:[#allocation8 + $0x8] sm:$0xff]  ;;  %v1151_v26 = vld [vmem:[#allocation8] sm:$0xff]  ;;  %s2270_s30 = scalar_lea.vmem [#allocation35], %s3260_s4  ;;  %s3908_s28 = sld [smem:[#allocation60_spill]]  ;;  %vm1857_vm5 = vcmask 253952  }
 0x123   : > { %2333 = vmatprep.subr.mxu0 %v3282_v3  ;;  %2344 = vmatprep.subr.mxu1 %v3282_v3  ;;  %v982_v9 = vld [vmem:[#allocation10] sm:$0xff]  ;;  %v1233_v28 = vld [vmem:[#allocation16 + $0x10] sm:$0xff]  ;;  %v1232_v29 = vld [vmem:[#allocation16 + $0x8] sm:$0xff]  ;;  %s2267_s11 = scalar_lea.vmem [#allocation33], %s3260_s4  ;;  %vm1937_vm6 = vcmask 516096   ;;  %p2625_p11 = scmp.eq.s32.totalorder %s3431_s15, 7 }
 0x124   : > { %2334 = vmatpush3.msra.mxu0 %v988_v4  ;;  %2345 = vmatpush3.msra.mxu1 %v984_v5  ;;  %v1137_v14 = vld [vmem:[#allocation13] sm:$0x1]  ;;  %v1229_v34 = vld [vmem:[#allocation14 + $0x10] sm:$0xff]  ;;  %v1228_v35 = vld [vmem:[#allocation14 + $0x8] sm:$0xff]  ;;  %s3284_s10 = smov [#allocation33]  }
 0x125   : > { %2335 = vmatprep.subr.mxu0 %v3282_v3  ;;  %2346 = vmatprep.subr.mxu1 %v3282_v3  ;;  %v1234_v27 = vld [vmem:[#allocation16 + $0x18] sm:$0xff]  ;;  %v1227_v36 = vld [vmem:[#allocation14] sm:$0xff]  ;;  %v1382_v46 = vld [vmem:[#allocation19 + $0x8] sm:$0xff]  ;;  %s1974_s6 = sshll.u32 %s3284_s10, 4  ;;  %s1975_s6 = int_to_ptr.vmem [resolvable:$true] %s1974_s6 }
 0x126   : > { %2336 = vmatpush3.msra.mxu0 %v987_v6  ;;  %2347 = vmatpush3.msra.mxu1 %v983_v7  ;;  %v3679_v10 = vld [vmem:[#allocation2] sm:$0x1]  ;;  %s979_s0 = scalar_lea.vmem [#allocation5], %s978_s7  ;;  %v1230_v33 = vld [vmem:[#allocation14 + $0x18] sm:$0xff]  ;;  %v1231_v37 = vld [vmem:[#allocation16] sm:$0xff]  ;;  %s3136_s2 = scalar_lea.vmem %s1975_s6, 128 }
 0x127   : > { %2337 = vmatprep.subr.mxu0 %v3282_v3  ;;  %2348 = vmatprep.subr.mxu1 %v3282_v3  ;;  %v980_v11 = vld [vmem:[%s979_s0] sm:$0x1]  ;;  %v1384_v38 = vld [vmem:[#allocation19 + $0x18] sm:$0xff]  ;;  %v1383_v44 = vld [vmem:[#allocation19 + $0x10] sm:$0xff]  ;;  %p3137_p0 = scmp.ne.s32.totalorder %s1975_s6, %s3136_s2  ;;  %p3143_p4 = scmp.lt.s32.totalorder %s1975_s6, %s1975_s6 }
 0x128   : > { %2338 = vmatpush3.msra.mxu0 %v986_v8  ;;  %2339 = vmatprep.mubr.msk.f32.mxu0 %vm3283_vm2, %v3282_v3  ;;  %v1462_v43 = vld [vmem:[#allocation26 + $0x18] sm:$0xff]  ;;  %v1461_v45 = vld [vmem:[#allocation26 + $0x10] sm:$0xff]  ;;  %v1460_v47 = vld [vmem:[#allocation26 + $0x8] sm:$0xff]  ;;  %p3144_p3 = scmp.lt.s32.totalorder %s3136_s2, %s3136_s2 }
 0x129   : > { %2349 = vmatpush3.msra.mxu1 %v982_v9  ;;  %2350 = vmatprep.mubr.msk.f32.mxu1 %vm3283_vm2, %v3282_v3  ;;  %v1381_v48 = vld [vmem:[#allocation19] sm:$0xff]  ;;  %v1619_v51 = vld [vmem:[#allocation28 + $0x10] sm:$0xff]  ;;  %v1618_v52 = vld [vmem:[#allocation28 + $0x8] sm:$0xff]  ;;  %p3138_p1 = pnand %p3137_p0, %p2625_p11 }
 0x12a   : > { %2340 = vmatmul.mubr.msk.f32.vlgmr.msra.gmra.mxu0 %vm990_vm1, %v3679_v10  ;;  %2351 = vmatmul.mubr.msk.f32.vlgmr.msra.gmra.mxu1 %vm990_vm1, %v980_v11  ;;  %v1459_v49 = vld [vmem:[#allocation26] sm:$0xff]  ;;  %v1620_v50 = vld [vmem:[#allocation28 + $0x18] sm:$0xff]  ;;  %v1776_v56 = vld [vmem:[%s3843_s18 + $0x8] sm:$0xff]  ;;  %p3145_p5 = por %p3144_p3, %p3143_p4 }
 0x12b   : > { %2353 = vmatprep.subr.mxu0 %v3282_v3  ;;  %2357 = vmatprep.mubr.msk.f32.mxu0 %vm3283_vm2, %v3282_v3  ;;  %v1617_v53 = vld [vmem:[#allocation28] sm:$0xff]  ;;  %v1777_v55 = vld [vmem:[%s3843_s18 + $0x10] sm:$0xff]  ;;  %v1544_v1 = vld [vmem:[#allocation20 + $0x10] sm:$0xff]  ;;  %p3139_p2 = pneg %p3138_p1 }
 0x12c   : > { %2360 = vmatprep.subr.mxu1 %v3282_v3  ;;  %2368 = vmatprep.mubr.msk.f32.mxu1 %vm3283_vm2, %v3282_v3  ;;  %v1778_v54 = vld [vmem:[%s3843_s18 + $0x18] sm:$0xff]  ;;  %v1775_v57 = vld [vmem:[%s3843_s18] sm:$0xff]  ;;  %v1378_v59 = vld [vmem:[#allocation17] sm:$0x1] }
 0x12d   : > { %2354 = vmatpush3.msra.mxu0 %v1152_v25  ;;  %2361 = vmatpush3.msra.mxu1 %v1234_v27  ;;  %v1545_v0 = vld [vmem:[#allocation20 + $0x18] sm:$0xff]  ;;  %v1543_v2 = vld [vmem:[#allocation20 + $0x8] sm:$0xff]  ;;  %v1542_v4 = vld [vmem:[#allocation20] sm:$0xff]  ;;  %p3146_p6 = pnand %p3145_p5, %p3139_p2 }
 0x12e   : > { %2355 = vmatprep.subr.mxu0 %v3282_v3  ;;  %2362 = vmatprep.subr.mxu1 %v3282_v3  ;;  %v1703_v5 = vld [vmem:[#allocation22 + $0x18] sm:$0xff]  ;;  %v1702_v6 = vld [vmem:[#allocation22 + $0x10] sm:$0xff]  ;;  %v1701_v7 = vld [vmem:[#allocation22 + $0x8] sm:$0xff] }
 0x12f   : > { %2356 = vmatpush3.msra.mxu0 %v1151_v26  ;;  %2363 = vmatpush3.msra.mxu1 %v1233_v28  ;;  %v1700_v8 = vld [vmem:[#allocation22] sm:$0xff] }
 0x130   : > { %2371 = vmatprep.subr.mxu0 %v3282_v3  ;;  %2364 = vmatprep.subr.mxu1 %v3282_v3  ;;  %v1546_v27 = vld [vmem:[#allocation25] sm:$0x1] }
 0x131   : > { %2365 = vmatpush3.msra.mxu1 %v1232_v29 }
 0x132   : > { %2366 = vmatprep.subr.mxu1 %v3282_v3 }
 0x133   : > { %2367 = vmatpush3.msra.mxu1 %v1231_v37 }
 0x134   : > { %2382 = vmatprep.subr.mxu1 %v3282_v3 }
 0x1ea   : > { %v1060_v12 = vpop.f32.mrf.mxu0  ;;  %v1133_v13 = vpop.f32.mrf.mxu1 }
 0x1eb   : > { %v1134_v15 = vadd.f32 %v1133_v13, %v1060_v12 }
 0x1ec   : > { %v2341_v16 = vpop.f32.mrf.mxu0  ;;  %v2352_v17 = vpop.f32.mrf.mxu1 }
 0x1ed   : > { %v1138_v18 = vadd.f32 %v1137_v14, %v1134_v15  ;;  %v1862_v16 = vld [vmem:[#allocation29 + $0x18] sm:$0xff]  ;;  %v1861_v17 = vld [vmem:[#allocation29 + $0x10] sm:$0xff] }
 0x1ef   : > { %v1140_v19 = vsel %vm1139_vm3, %v1138_v18, -inf }
 0x1f0   : > { %1141 = vmax.xlane.f32.xlu0 %v1140_v19  ;;  %v1859_v19 = vld [vmem:[#allocation29] sm:$0xff] }
 0x279   : > { %v1142_v20 = vpop.xlane.xlu0 %1141 }
 0x27a   : > { %v1143_v21 = vsub.f32 %v1138_v18, %v1142_v20  ;;  %v1860_v18 = vld [vmem:[#allocation29 + $0x8] sm:$0xff]  ;;  %v1385_v20 = vld [vmem:[#allocation23] sm:$0x1] }
 0x27c   : > { %v1144_v22 = vmul.f32 1.442695, %v1143_v21 }
 0x27e   : > { %2664 = vpow2.f32 %v1144_v22 }
 0x28b   : > { %v2665_v23 = vpop.eup %2664 }
 0x28c   : > { %v1146_v24 = vsel %vm1139_vm3, %v2665_v23, 0.0 }
 0x28d   : > { %1147 = vadd.xlane.f32.xlu0 %v1146_v24 }
 0x316   : > { %v1148_v30 = vpop.xlane.xlu0 %1147 }
 0x317   : > { %2666 = vrcp.f32 %v1148_v30 }
 0x324   : > { %v2667_v31 = vpop.eup %2666 }
 0x325   : > { %v1150_v32 = vmul.f32 %v2667_v31, %v2665_v23  ;;  %v1534_v23 = vld [vmem:[%s3844_s19] sm:$0x1] }
 0x327   : > { %2358 = vmatmul.mubr.msk.f32.vlgmr.msra.gmra.mxu0 %vm1153_vm4, %v1150_v32  ;;  %2272 = vst.msk [vmem:[%s2270_s30 - $0x1] sm:$0x1] %vm1139_vm3, %v1150_v32 }
 0x328   : > { %2372 = vmatpush3.msra.mxu0 %v1230_v33  ;;  %2379 = vmatprep.mubr.msk.f32.mxu0 %vm3283_vm2, %v3282_v3 }
 0x329   : > { %2373 = vmatprep.subr.mxu0 %v3282_v3 }
 0x32a   : > { %2374 = vmatpush3.msra.mxu0 %v1229_v34 }
 0x32b   : > { %2375 = vmatprep.subr.mxu0 %v3282_v3 }
 0x32c   : > { %2376 = vmatpush3.msra.mxu0 %v1228_v35 }
 0x32d   : > { %2377 = vmatprep.subr.mxu0 %v3282_v3 }
 0x32e   : > { %2378 = vmatpush3.msra.mxu0 %v1227_v36 }
 0x32f   : > { %2380 = vmatmul.mubr.msk.f32.vlgmr.msra.gmra.mxu0 %vm990_vm1, %v980_v11  ;;  %2393 = vmatprep.subr.mxu0 %v3282_v3 }
 0x330   : > { %2401 = vmatprep.mubr.msk.f32.mxu0 %vm3283_vm2, %v3282_v3  ;;  %2394 = vmatpush3.msra.mxu0 %v1462_v43  ;;  %v1704_v43 = vld [vmem:[%s3908_s28] sm:$0x1] }
 0x331   : > { %2395 = vmatprep.subr.mxu0 %v3282_v3 }
 0x332   : > { %2396 = vmatpush3.msra.mxu0 %v1461_v45 }
 0x333   : > { %2397 = vmatprep.subr.mxu0 %v3282_v3 }
 0x334   : > { %2398 = vmatpush3.msra.mxu0 %v1460_v47 }
 0x335   : > { %2399 = vmatprep.subr.mxu0 %v3282_v3 }
 0x336   : > { %2400 = vmatpush3.msra.mxu0 %v1459_v49 }
 0x337   : > { %2402 = vmatmul.mubr.msk.f32.vlgmr.msra.gmra.mxu0 %vm990_vm1, %v3679_v10  ;;  %2415 = vmatprep.subr.mxu0 %v3282_v3 }
 0x338   : > { %2423 = vmatprep.mubr.msk.f32.mxu0 %vm3283_vm2, %v3282_v3  ;;  %2416 = vmatpush3.msra.mxu0 %v1620_v50 }
 0x339   : > { %2417 = vmatprep.subr.mxu0 %v3282_v3 }
 0x33a   : > { %2418 = vmatpush3.msra.mxu0 %v1619_v51 }
 0x33b   : > { %2419 = vmatprep.subr.mxu0 %v3282_v3 }
 0x33c   : > { %2420 = vmatpush3.msra.mxu0 %v1618_v52 }
 0x33d   : > { %2421 = vmatprep.subr.mxu0 %v3282_v3 }
 0x33e   : > { %2422 = vmatpush3.msra.mxu0 %v1617_v53 }
 0x33f   : > { %2424 = vmatmul.mubr.msk.f32.vlgmr.msra.gmra.mxu0 %vm990_vm1, %v3679_v10  ;;  %2437 = vmatprep.subr.mxu0 %v3282_v3 }
 0x340   : > { %2445 = vmatprep.mubr.msk.f32.mxu0 %vm3283_vm2, %v3282_v3  ;;  %2438 = vmatpush3.msra.mxu0 %v1778_v54  ;;  %v1863_v54 = vld [vmem:[#allocation31] sm:$0x1] }
 0x341   : > { %2439 = vmatprep.subr.mxu0 %v3282_v3 }
 0x342   : > { %2440 = vmatpush3.msra.mxu0 %v1777_v55 }
 0x343   : > { %2441 = vmatprep.subr.mxu0 %v3282_v3 }
 0x344   : > { %2442 = vmatpush3.msra.mxu0 %v1776_v56 }
 0x345   : > { %2443 = vmatprep.subr.mxu0 %v3282_v3 }
 0x346   : > { %2444 = vmatpush3.msra.mxu0 %v1775_v57 }
 0x347   : > { %2446 = vmatmul.mubr.msk.f32.vlgmr.msra.gmra.mxu0 %vm990_vm1, %v3679_v10 }
 0x3e7   : > { %v1223_v39 = vpop.f32.mrf.mxu0 }
 0x3e8   : > { %2369 = vmatmul.mubr.msk.f32.vlgmr.msra.gmra.mxu1 %vm990_vm1, %v1223_v39 }
 0x3e9   : > { %v2359_v40 = vpop.f32.mrf.mxu0  ;;  %2383 = vmatpush3.msra.mxu1 %v1384_v38  ;;  %2390 = vmatprep.mubr.msk.f32.mxu1 %vm3283_vm2, %v3282_v3 }
 0x3ea   : > { %2384 = vmatprep.subr.mxu1 %v3282_v3  ;;  %v1779_v40 = vld [vmem:[%s3846_s21] sm:$0x1] }
 0x3eb   : > { %2385 = vmatpush3.msra.mxu1 %v1383_v44 }
 0x3ec   : > { %2386 = vmatprep.subr.mxu1 %v3282_v3 }
 0x3ed   : > { %2387 = vmatpush3.msra.mxu1 %v1382_v46 }
 0x3ee   : > { %2388 = vmatprep.subr.mxu1 %v3282_v3 }
 0x3ef   : > { %v1374_v41 = vpop.f32.mrf.mxu0  ;;  %2389 = vmatpush3.msra.mxu1 %v1381_v48 }
 0x3f0   : > { %2404 = vmatprep.subr.mxu1 %v3282_v3 }
 0x3f1   : > { %v2381_v42 = vpop.f32.mrf.mxu0 }
 0x3f7   : > { %v1529_v9 = vpop.f32.mrf.mxu0 }
 0x3f9   : > { %v2403_v11 = vpop.f32.mrf.mxu0 }
 0x3ff   : > { %v1687_v12 = vpop.f32.mrf.mxu0 }
 0x401   : > { %v2425_v13 = vpop.f32.mrf.mxu0 }
 0x407   : > { %v1846_v14 = vpop.f32.mrf.mxu0 }
 0x408   : > { %v1847_v42 = vadd.f32 %v1846_v14, %v1779_v40 }
 0x409   : > { %v2447_v15 = vpop.f32.mrf.mxu0 }
 0x4a8   : > { %v1304_v58 = vpop.f32.mrf.mxu1 }
 0x4a9   : > { %v1375_v60 = vadd.f32 %v1374_v41, %v1304_v58 }
 0x4aa   : > { %v2370_v61 = vpop.f32.mrf.mxu1 }
 0x4ab   : > { %v1379_v62 = vadd.f32 %v1378_v59, %v1375_v60 }
 0x4ad   : > { %v1380_v63 = vmax.f32 %v1379_v62, 0.0 }
 0x4af   : > { %2391 = vmatmul.mubr.msk.f32.vlgmr.msra.gmra.mxu1 %vm990_vm1, %v1380_v63 }
 0x4b0   : > { %2405 = vmatpush3.msra.mxu1 %v1545_v0  ;;  %2412 = vmatprep.mubr.msk.f32.mxu1 %vm3283_vm2, %v3282_v3 }
 0x4b1   : > { %2406 = vmatprep.subr.mxu1 %v3282_v3 }
 0x4b2   : > { %2407 = vmatpush3.msra.mxu1 %v1544_v1 }
 0x4b3   : > { %2408 = vmatprep.subr.mxu1 %v3282_v3 }
 0x4b4   : > { %2409 = vmatpush3.msra.mxu1 %v1543_v2 }
 0x4b5   : > { %2410 = vmatprep.subr.mxu1 %v3282_v3 }
 0x4b6   : > { %2411 = vmatpush3.msra.mxu1 %v1542_v4 }
 0x4b7   : > { %2413 = vmatmul.mubr.msk.f32.vlgmr.msra.gmra.mxu1 %vm990_vm1, %v1380_v63  ;;  %2426 = vmatprep.subr.mxu1 %v3282_v3 }
 0x4b8   : > { %2427 = vmatpush3.msra.mxu1 %v1703_v5  ;;  %2434 = vmatprep.mubr.msk.f32.mxu1 %vm3283_vm2, %v3282_v3 }
 0x4b9   : > { %2428 = vmatprep.subr.mxu1 %v3282_v3 }
 0x4ba   : > { %2429 = vmatpush3.msra.mxu1 %v1702_v6 }
 0x4bb   : > { %2430 = vmatprep.subr.mxu1 %v3282_v3 }
 0x4bc   : > { %2431 = vmatpush3.msra.mxu1 %v1701_v7 }
 0x4bd   : > { %2432 = vmatprep.subr.mxu1 %v3282_v3 }
 0x4be   : > { %2433 = vmatpush3.msra.mxu1 %v1700_v8 }
 0x4bf   : > { %2435 = vmatmul.mubr.msk.f32.vlgmr.msra.gmra.mxu1 %vm990_vm1, %v1380_v63  ;;  %2448 = vmatprep.subr.mxu1 %v3282_v3 }
 0x4c0   : > { %2456 = vmatprep.mubr.msk.f32.mxu1 %vm3283_vm2, %v3282_v3  ;;  %2449 = vmatpush3.msra.mxu1 %v1862_v16 }
 0x4c1   : > { %2450 = vmatprep.subr.mxu1 %v3282_v3 }
 0x4c2   : > { %2451 = vmatpush3.msra.mxu1 %v1861_v17 }
 0x4c3   : > { %2452 = vmatprep.subr.mxu1 %v3282_v3 }
 0x4c4   : > { %2453 = vmatpush3.msra.mxu1 %v1860_v18 }
 0x4c5   : > { %2454 = vmatprep.subr.mxu1 %v3282_v3  ;;  %v1692_v3 = vld [vmem:[%s3845_s20] sm:$0x1] }
 0x4c6   : > { %2455 = vmatpush3.msra.mxu1 %v1859_v19 }
 0x56f   : > { %v1455_v21 = vpop.f32.mrf.mxu1 }
 0x570   : > { %v1456_v22 = vadd.f32 %v1455_v21, %v1385_v20 }
 0x571   : > { %v2392_v24 = vpop.f32.mrf.mxu1 }
 0x572   : > { %v1533_v25 = vadd.f32 %v1529_v9, %v1456_v22 }
 0x574   : > { %v1535_v26 = vadd.f32 %v1534_v23, %v1533_v25 }
 0x576   : > { %v2246_v28 = vmul.f32 -1.442695, %v1535_v26 }
 0x577   : > { %v1613_v29 = vpop.f32.mrf.mxu1 }
 0x578   : > { %2668 = vpow2.f32 %v2246_v28  ;;  %v1614_v30 = vadd.f32 %v1613_v29, %v1546_v27 }
 0x579   : > { %v2414_v31 = vpop.f32.mrf.mxu1 }
 0x57a   : > { %v1691_v32 = vadd.f32 %v1687_v12, %v1614_v30 }
 0x57c   : > { %v1693_v33 = vadd.f32 %v1692_v3, %v1691_v32 }
 0x57e   : > { %v2249_v34 = vmul.f32 -1.442695, %v1693_v33 }
 0x57f   : > { %v1771_v35 = vpop.f32.mrf.mxu1 }
 0x580   : > { %2670 = vpow2.f32 %v2249_v34  ;;  %v1772_v45 = vadd.f32 %v1771_v35, %v1704_v43 }
 0x581   : > { %v2436_v36 = vpop.f32.mrf.mxu1 }
 0x585   : > { %v2669_v37 = vpop.eup %2668 }
 0x586   : > { %v1539_v38 = vadd.f32 1.0, %v2669_v37 }
 0x588   : > { %2672 = vrcp.f32 %v1539_v38 }
 0x58d   : > { %v2671_v39 = vpop.eup %2670 }
 0x58e   : > { %v1697_v41 = vadd.f32 1.0, %v2671_v39 }
 0x590   : > { %2674 = vrcp.f32 %v1697_v41 }
 0x595   : > { %v2673_v44 = vpop.eup %2672 }
 0x596   : > { %v1850_v46 = vmul.f32 %v2673_v44, %v1847_v42 }
 0x598   : > { %v1851_v47 = vadd.f32 %v1850_v46, %v1772_v45 }
 0x59a   : > { %2676 = vtanh.f32 %v1851_v47 }
 0x59d   : > { %v2675_v48 = vpop.eup %2674 }
 0x59e   : > { %v1853_v49 = vsub.f32 1.0, %v2675_v48  ;;  %v1855_v52 = vmul.f32 %v2675_v48, %v3679_v10 }
 0x5a7   : > { %v2677_v50 = vpop.eup %2676 }
 0x5a8   : > { %v1854_v51 = vmul.f32 %v2677_v50, %v1853_v49 }
 0x5aa   : > { %v1856_v53 = vadd.f32 %v1855_v52, %v1854_v51 }
 0x5ac   : > { %2457 = vmatmul.mubr.msk.f32.vlgmr.msra.gmra.mxu1 %vm990_vm1, %v1856_v53  ;;  %1858 = vst.msk [vmem:[#allocation2] sm:$0x1] %vm1857_vm5, %v1856_v53  ;;  %2269 = vst.msk [vmem:[%s2267_s11 - $0x1] sm:$0x1] %vm1857_vm5, %v1856_v53 }
 0x66c   : > { %v1933_v55 = vpop.f32.mrf.mxu1 }
 0x66d   : > { %v1934_v56 = vadd.f32 %v1933_v55, %v1863_v54 }
 0x66e   : > { %v2458_v57 = vpop.f32.mrf.mxu1 }
 0x66f   : > { %v1938_v58 = vsel %vm1937_vm6, %v1934_v56, -inf }
 0x670   : > { %1939 = vmax.xlane.f32.xlu1 %v1938_v58 }
 0x6f9   : > { %v1940_v59 = vpop.xlane.xlu1 %1939 }
 0x6fa   : > { %v1941_v60 = vsub.f32 %v1934_v56, %v1940_v59 }
 0x6fc   : > { %v1942_v10 = vmul.f32 1.442695, %v1941_v60 }
 0x6fe   : > { %2678 = vpow2.f32 %v1942_v10 }
 0x70b   : > { %v2679_v61 = vpop.eup %2678 }
 0x70c   : > { %v1944_v62 = vsel %vm1937_vm6, %v2679_v61, 0.0 }
 0x70d   : > { %1945 = vadd.xlane.f32.xlu1 %v1944_v62 }
 0x70e   : > { %3149 = shalt.err (!%p3146_p6)
}
 0x70f   : > { %2530 = dma.vmem_to_hbm [thread:$0]  (%p2625_p11), %s1975_s6, 128, %s3850_s25, [#allocation34]  }
 0x710   : > { %s3285_s27 = smov [#allocation35]  }
 0x711   : > { %s1985_s29 = sshll.u32 %s3285_s27, 4  ;;  %s1986_s29 = int_to_ptr.vmem [resolvable:$true] %s1985_s29 }
 0x712   : > { %s3160_s5 = scalar_lea.vmem %s1986_s29, 128  ;;  %p3167_p7 = scmp.lt.s32.totalorder %s1986_s29, %s1986_s29 }
 0x713   : > { %p3161_p13 = scmp.ne.s32.totalorder %s1986_s29, %s3160_s5  ;;  %p3168_p8 = scmp.lt.s32.totalorder %s3160_s5, %s3160_s5 }
 0x715   : > { %p3162_p10 = pnand %p3161_p13, %p2625_p11  ;;  %p3169_p9 = por %p3168_p8, %p3167_p7 }
 0x717   : > { %p3163_p12 = pneg %p3162_p10 }
 0x719   : > { %p3170_p0 = pnand %p3169_p9, %p3163_p12 }
 0x71b   : > { %3173 = shalt.err (!%p3170_p0)
}
 0x71c   : > { %2532 = dma.vmem_to_hbm [thread:$0]  (%p2625_p11), %s1986_s29, 128, %s3851_s26, [#allocation34]  }
 0x71d   : > { %s3286_s0 = smov [#allocation32]   ;;  %s2264_s8 = scalar_lea.vmem [#allocation32], %s3260_s4 }
 0x71e   : > { %s1963_s30 = sshll.u32 %s3286_s0, 4  ;;  %s1964_s30 = int_to_ptr.vmem [resolvable:$true] %s1963_s30 }
 0x71f   : > { %s3184_s28 = scalar_lea.vmem %s1964_s30, 128  ;;  %p3191_p3 = scmp.lt.s32.totalorder %s1964_s30, %s1964_s30 }
 0x720   : > { %p3185_p1 = scmp.ne.s32.totalorder %s1964_s30, %s3184_s28  ;;  %p3192_p5 = scmp.lt.s32.totalorder %s3184_s28, %s3184_s28 }
 0x722   : > { %p3186_p2 = pnand %p3185_p1, %p2625_p11  ;;  %p3193_p6 = por %p3192_p5, %p3191_p3 }
 0x724   : > { %p3187_p4 = pneg %p3186_p2 }
 0x726   : > { %p3194_p13 = pnand %p3193_p6, %p3187_p4 }
 0x796   : > { %v1946_v63 = vpop.xlane.xlu1 %1945 }
 0x797   : > { %2680 = vlog2.f32 %v1946_v63 }
 0x7a4   : > { %v2681_v0 = vpop.eup %2680 }
 0x7a5   : > { %v1948_v1 = vmul.f32 0.6931472, %v2681_v0 }
 0x7a7   : > { %v1949_v2 = vsub.f32 %v1941_v60, %v1948_v1 }
 0x7a9   : > { %2266 = vst.msk [vmem:[%s2264_s8 - $0x1] sm:$0x1] %vm1937_vm6, %v1949_v2 }
 0x7aa   : > { %3197 = shalt.err (!%p3194_p13)
}
 0x7ab   : > { %2528 = dma.vmem_to_hbm [thread:$0]  (%p2625_p11), %s1964_s30, 128, %s3849_s24, [#allocation7]  }
 0x7ac   : > { %3251 = dma.done.wait (%p2625_p11), [#allocation7], 128  }
 0x7ad   : > { %3253 = vsyncadd (%p2625_p11), [#allocation7], 4294967168 }
 0x7ae   : > { %3255 = dma.done.wait (%p2625_p11), [#allocation34], 256  }
 0x7af   : > { %3257 = vsyncadd (%p2625_p11), [#allocation34], 4294967040 }
 0x7b0 PF: > { %s54_s4 = sadd.s32 1, %s3260_s4  }
 0x7b1   : > { %p51_p10 = scmp.ge.s32.totalorder %s54_s4, 10  }
 0x7b3   :  { %53 = sbr.rel (!%p51_p10) target bundleno = 45 (0x2d), region = 229 }
 0x7b8   :  { %2006 = vsyncpa [#allocation6], 1 }
 0x7b9   :  { %2008 = vsyncpa [#allocation6 + $0x1], 1 }
 0x7ba   :  { %2009 = vsyncpa [#allocation9], 1 }
 0x7bb   :  { %2010 = vsyncpa [#allocation12], 1 }
 0x7bc   :  { %2011 = vsyncpa [#allocation15], 1 }
 0x7bd   :  { %2012 = vsyncpa [#allocation18], 1 }
 0x7be   :  { %2013 = vsyncpa [#allocation21], 1 }
 0x7bf   :  { %2014 = vsyncpa [#allocation24], 1 }
 0x7c0   :  { %2015 = vsyncpa [#allocation27], 1 }
 0x7c1   :  { %2016 = vsyncpa [#allocation30], 1 }
 0x7c2   :  { %2017 = vsyncpa [#allocation7], 1 }
 0x7c3   :  { %2019 = vsyncpa [#allocation7 + $0x1], 1 }
 0x7c4   :  { %2020 = vsyncpa [#allocation34], 1 }

</bundles_post_ra>
